<compile_context>
chip_gen: v7x
topology: tpu7x:2x2x1
jax: 0.10.0
libtpu: 0.0.40
codegen_flags: <defaults>
</compile_context>

<pallas_src>
import jax
import jax.numpy as jnp
from jax import lax
from jax.experimental import pallas as pl
from jax.experimental.pallas import tpu as pltpu


def _rpn_kernel(xc_ref, w1_ref, b1_ref, wh_ref, bh_ref, out_ref):
    # xc_ref : (1, TILE_M, 9*Cin) bf16  im2col'd input rows for this tile
    # w1_ref : (9*Cin, Chid)      bf16  3x3 conv weights, taps folded into K
    # b1_ref : (1, Chid)          f32
    # wh_ref : (Chid, C_fused)    bf16  [wo | wt | zero-pad] fused head weight
    # bh_ref : (1, C_fused)       f32   [bo | bt | zero-pad]
    # out_ref: (1, TILE_M, C_fused) f32 lane-dense fused head output
    x = xc_ref[0]                                                  # (TILE_M, 9*Cin)

    # 3x3 conv (pad=1) == one MXU matmul on the im2col'd rows.
    acc = jnp.dot(x, w1_ref[...], preferred_element_type=jnp.float32)

    # Bias + ReLU in f32 on the VPU.
    feat = jnp.maximum(acc + b1_ref[...], 0.0)                     # (TILE_M, Chid)

    # Fused objectness+transformer head: one lane-dense (512 x 128) matmul.
    head = jnp.dot(feat.astype(wh_ref.dtype), wh_ref[...],
                   preferred_element_type=jnp.float32) + bh_ref[...]
    out_ref[0] = head


def _pick_tile_m(hw):
    for t in (512, 256, 128):
        if hw % t == 0:
            return t
    return hw  # small / odd feature maps: whole plane per step


def rpn_forward(x_nchw, w1, b1, wo, bo, wt, bt):
    """Pallas RPN forward.

    x_nchw: (B, Cin, H, W) float32 (PyTorch NCHW convention)
    w1:     (3, 3, Cin, Chid), b1: (Chid,)
    wo:     (Chid, Cobj),      bo: (Cobj,)
    wt:     (Chid, Ctr),       bt: (Ctr,)
    Returns (objectnesses (B*H*W*A, 2), transformers (B*H*W*A, 4))
    """
    B, Cin, H, W = x_nchw.shape
    Chid = w1.shape[-1]
    Cobj = wo.shape[-1]
    Ctr = wt.shape[-1]
    HW = H * W
    K9 = 9 * Cin
    C_fused = max(128, -(-(Cobj + Ctr) // 128) * 128)   # lane-dense head width
    pad_cols = C_fused - Cobj - Ctr

    # ---- wrapper-side prepack: im2col, head fusion, bf16 casts ----
    x_nhwc = jnp.transpose(x_nchw, (0, 2, 3, 1)).astype(jnp.bfloat16)
    x_pad = jnp.pad(x_nhwc, ((0, 0), (1, 1), (1, 1), (0, 0)))
    taps = [x_pad[:, dy:dy + H, dx:dx + W, :]
            for dy in range(3) for dx in range(3)]
    x_col = jnp.concatenate(taps, axis=-1).reshape(B, HW, K9)       # (B, HW, 9*Cin)

    w1_flat = w1.reshape(K9, Chid).astype(jnp.bfloat16)             # (9*Cin, Chid)
    b1_2d = b1.reshape(1, Chid).astype(jnp.float32)

    w_head = jnp.concatenate(
        [wo, wt, jnp.zeros((Chid, pad_cols), wo.dtype)], axis=1).astype(jnp.bfloat16)
    b_head = jnp.concatenate(
        [bo, bt, jnp.zeros((pad_cols,), bo.dtype)]).reshape(1, C_fused).astype(jnp.float32)

    tile_m = _pick_tile_m(HW)
    num_m = HW // tile_m

    flops = 2 * B * HW * Chid * (K9 + C_fused)
    bytes_accessed = (x_col.size * 2 + w1_flat.size * 2 + w_head.size * 2
                      + b1_2d.size * 4 + b_head.size * 4
                      + B * HW * C_fused * 4)

    out = pl.pallas_call(
        _rpn_kernel,
        out_shape=jax.ShapeDtypeStruct((B, HW, C_fused), jnp.float32),
        grid_spec=pltpu.PrefetchScalarGridSpec(
            num_scalar_prefetch=0,
            grid=(B, num_m),
            in_specs=[
                pl.BlockSpec((1, tile_m, K9), lambda b, m: (b, m, 0)),
                pl.BlockSpec((K9, Chid), lambda b, m: (0, 0)),
                pl.BlockSpec((1, Chid), lambda b, m: (0, 0)),
                pl.BlockSpec((Chid, C_fused), lambda b, m: (0, 0)),
                pl.BlockSpec((1, C_fused), lambda b, m: (0, 0)),
            ],
            out_specs=pl.BlockSpec((1, tile_m, C_fused), lambda b, m: (b, m, 0)),
        ),
        compiler_params=pltpu.CompilerParams(
            dimension_semantics=("parallel", "parallel")),
        cost_estimate=pl.CostEstimate(
            flops=flops, transcendentals=0, bytes_accessed=bytes_accessed),
    )(x_col, w1_flat, b1_2d, w_head, b_head)

    # Matches PyTorch: permute(0,2,3,1).contiguous().view(-1, 2) / (-1, 4)
    objectnesses = out[:, :, :Cobj].reshape(-1, 2)
    transformers = out[:, :, Cobj:Cobj + Ctr].reshape(-1, 4)
    return objectnesses, transformers


def rpn_forward_reference(x_nchw, w1, b1, wo, bo, wt, bt,
                          compute_dtype=jnp.float32):
    """Pure-JAX reference (lax.conv) for correctness check."""
    x_nhwc = jnp.transpose(x_nchw, (0, 2, 3, 1)).astype(compute_dtype)
    feat = lax.conv_general_dilated(
        x_nhwc, w1.astype(compute_dtype), window_strides=(1, 1), padding="SAME",
        dimension_numbers=("NHWC", "HWIO", "NHWC"),
        preferred_element_type=jnp.float32)
    feat = jnp.maximum(feat + b1, 0.0)
    obj = jnp.einsum("bhwc,cd->bhwd", feat.astype(compute_dtype),
                     wo.astype(compute_dtype),
                     preferred_element_type=jnp.float32) + bo
    tr = jnp.einsum("bhwc,cd->bhwd", feat.astype(compute_dtype),
                    wt.astype(compute_dtype),
                    preferred_element_type=jnp.float32) + bt
    return obj.reshape(-1, 2), tr.reshape(-1, 4)


if __name__ == "__main__":
    # Small, deterministic example shapes consistent with the module.
    B, Cin, H, W = 2, 4, 16, 16
    Chid = 512                                 # hard-coded in RPN.__init__
    anchor_ratios = [(1, 2), (1, 1), (2, 1)]   # 3 ratios
    anchor_scales = [1, 2, 4]                  # 3 scales
    num_anchors = len(anchor_ratios) * len(anchor_scales)  # 9
    Cobj = num_anchors * 2                     # 18
    Ctr = num_anchors * 4                      # 36

    key = jax.random.PRNGKey(0)
    k = jax.random.split(key, 8)
    x = jax.random.normal(k[0], (B, Cin, H, W), dtype=jnp.float32)
    w1 = jax.random.normal(k[1], (3, 3, Cin, Chid), dtype=jnp.float32) * 0.05
    b1 = jax.random.normal(k[2], (Chid,), dtype=jnp.float32) * 0.05
    wo = jax.random.normal(k[3], (Chid, Cobj), dtype=jnp.float32) * 0.05
    bo = jax.random.normal(k[4], (Cobj,), dtype=jnp.float32) * 0.05
    wt = jax.random.normal(k[5], (Chid, Ctr), dtype=jnp.float32) * 0.05
    bt = jax.random.normal(k[6], (Ctr,), dtype=jnp.float32) * 0.05

    obj, tr = rpn_forward(x, w1, b1, wo, bo, wt, bt)
    obj, tr = jax.block_until_ready((obj, tr))

    assert obj.shape == (B * H * W * num_anchors, 2)
    assert tr.shape == (B * H * W * num_anchors, 4)

    # Matched-precision reference (bf16 matmul operands, f32 accumulation).
    obj_bf, tr_bf = rpn_forward_reference(x, w1, b1, wo, bo, wt, bt,
                                          compute_dtype=jnp.bfloat16)
    assert jnp.allclose(obj, obj_bf, atol=1e-2, rtol=1e-2)
    assert jnp.allclose(tr, tr_bf, atol=1e-2, rtol=1e-2)

    # Full-f32 reference: bf16 operands widen error slightly -> loose tolerance.
    obj_f32, tr_f32 = rpn_forward_reference(x, w1, b1, wo, bo, wt, bt)
    assert jnp.allclose(obj, obj_f32, atol=5e-2, rtol=5e-2)
    assert jnp.allclose(tr, tr_f32, atol=5e-2, rtol=5e-2)

    print("KERNEL_OK")
</pallas_src>

<mosaic_0001>
module attributes {stable_mosaic.version = 11 : i64} {
  func.func @_rpn_kernel(%arg0: i32, %arg1: i32, %arg2: memref<1x256x36xbf16, #tpu.memory_space<vmem>>, %arg3: memref<36x512xbf16, #tpu.memory_space<vmem>>, %arg4: memref<1x512xf32, #tpu.memory_space<vmem>>, %arg5: memref<512x128xbf16, #tpu.memory_space<vmem>>, %arg6: memref<1x128xf32, #tpu.memory_space<vmem>>, %arg7: memref<1x256x128xf32, #tpu.memory_space<vmem>>) attributes {dimension_semantics = [#tpu.dimension_semantics<parallel>, #tpu.dimension_semantics<parallel>], iteration_bounds = array<i64: 2, 1>, scalar_prefetch = 0 : i64, scratch_operands = 0 : i64, tpu.core_type = #tpu.core_type<tc>, window_params = [{transform_indices = @transform_0, window_bounds = array<i64: 1, 256, 36>}, {pipeline_mode = #tpu.pipeline_mode<synchronous>, transform_indices = @transform_1, window_bounds = array<i64: 36, 512>}, {pipeline_mode = #tpu.pipeline_mode<synchronous>, transform_indices = @transform_2, window_bounds = array<i64: 1, 512>}, {pipeline_mode = #tpu.pipeline_mode<synchronous>, transform_indices = @transform_3, window_bounds = array<i64: 512, 128>}, {pipeline_mode = #tpu.pipeline_mode<synchronous>, transform_indices = @transform_4, window_bounds = array<i64: 1, 128>}, {transform_indices = @transform_5, window_bounds = array<i64: 1, 256, 128>}]} {
    %c0 = arith.constant 0 : index
    %c0_0 = arith.constant 0 : index
    %c0_1 = arith.constant 0 : index
    %0 = vector.load %arg2[%c0, %c0_0, %c0_1] : memref<1x256x36xbf16, #tpu.memory_space<vmem>>, vector<1x256x36xbf16>
    %1 = vector.shape_cast %0 : vector<1x256x36xbf16> to vector<256x36xbf16>
    %c0_2 = arith.constant 0 : index
    %c0_3 = arith.constant 0 : index
    %2 = vector.load %arg3[%c0_2, %c0_3] : memref<36x512xbf16, #tpu.memory_space<vmem>>, vector<36x512xbf16>
    %cst = arith.constant dense<0.000000e+00> : vector<256x512xf32>
    %3 = tpu.matmul %1, %2, %cst {dimension_numbers = #tpu.dot_dimension_numbers<[1], [0], [0], [1], [0, 0, 1, 1], [], []>} : vector<256x36xbf16>, vector<36x512xbf16>, vector<256x512xf32> -> vector<256x512xf32>
    %c0_4 = arith.constant 0 : index
    %c0_5 = arith.constant 0 : index
    %4 = vector.load %arg4[%c0_4, %c0_5] : memref<1x512xf32, #tpu.memory_space<vmem>>, vector<1x512xf32>
    %5 = vector.broadcast %4 : vector<1x512xf32> to vector<256x512xf32>
    %6 = arith.addf %3, %5 : vector<256x512xf32>
    %cst_6 = arith.constant 0.000000e+00 : f32
    %7 = vector.broadcast %cst_6 : f32 to vector<256x512xf32>
    %8 = arith.maximumf %6, %7 : vector<256x512xf32>
    %9 = arith.truncf %8 : vector<256x512xf32> to vector<256x512xbf16>
    %c0_7 = arith.constant 0 : index
    %c0_8 = arith.constant 0 : index
    %10 = vector.load %arg5[%c0_7, %c0_8] : memref<512x128xbf16, #tpu.memory_space<vmem>>, vector<512x128xbf16>
    %cst_9 = arith.constant dense<0.000000e+00> : vector<256x128xf32>
    %11 = tpu.matmul %9, %10, %cst_9 {dimension_numbers = #tpu.dot_dimension_numbers<[1], [0], [0], [1], [0, 0, 1, 1], [], []>} : vector<256x512xbf16>, vector<512x128xbf16>, vector<256x128xf32> -> vector<256x128xf32>
    %c0_10 = arith.constant 0 : index
    %c0_11 = arith.constant 0 : index
    %12 = vector.load %arg6[%c0_10, %c0_11] : memref<1x128xf32, #tpu.memory_space<vmem>>, vector<1x128xf32>
    %13 = vector.broadcast %12 : vector<1x128xf32> to vector<256x128xf32>
    %14 = arith.addf %11, %13 : vector<256x128xf32>
    %c0_12 = arith.constant 0 : index
    %c0_13 = arith.constant 0 : index
    %c0_14 = arith.constant 0 : index
    %15 = vector.load %arg7[%c0_12, %c0_13, %c0_14] : memref<1x256x128xf32, #tpu.memory_space<vmem>>, vector<1x256x128xf32>
    %16 = vector.shape_cast %15 : vector<1x256x128xf32> to vector<256x128xf32>
    %17 = vector.shape_cast %14 : vector<256x128xf32> to vector<1x256x128xf32>
    tpu.vector_store %arg7[%c0_12, %c0_13, %c0_14], %17 {strides = array<i32>} : memref<1x256x128xf32, #tpu.memory_space<vmem>>, vector<1x256x128xf32>,
    return
  }
  func.func @transform_0(%arg0: i32, %arg1: i32) -> (i32, i32, i32) {
    %c0_i32 = arith.constant 0 : i32
    %c0_i32_0 = arith.constant 0 : i32
    return %arg0, %arg1, %c0_i32 : i32, i32, i32
  }
  func.func @transform_1(%arg0: i32, %arg1: i32) -> (i32, i32) {
    %c0_i32 = arith.constant 0 : i32
    %c0_i32_0 = arith.constant 0 : i32
    %c0_i32_1 = arith.constant 0 : i32
    return %c0_i32, %c0_i32_0 : i32, i32
  }
  func.func @transform_2(%arg0: i32, %arg1: i32) -> (i32, i32) {
    %c0_i32 = arith.constant 0 : i32
    %c0_i32_0 = arith.constant 0 : i32
    %c0_i32_1 = arith.constant 0 : i32
    return %c0_i32, %c0_i32_0 : i32, i32
  }
  func.func @transform_3(%arg0: i32, %arg1: i32) -> (i32, i32) {
    %c0_i32 = arith.constant 0 : i32
    %c0_i32_0 = arith.constant 0 : i32
    %c0_i32_1 = arith.constant 0 : i32
    return %c0_i32, %c0_i32_0 : i32, i32
  }
  func.func @transform_4(%arg0: i32, %arg1: i32) -> (i32, i32) {
    %c0_i32 = arith.constant 0 : i32
    %c0_i32_0 = arith.constant 0 : i32
    %c0_i32_1 = arith.constant 0 : i32
    return %c0_i32, %c0_i32_0 : i32, i32
  }
  func.func @transform_5(%arg0: i32, %arg1: i32) -> (i32, i32, i32) {
    %c0_i32 = arith.constant 0 : i32
    %c0_i32_0 = arith.constant 0 : i32
    return %arg0, %arg1, %c0_i32 : i32, i32, i32
  }
}

</mosaic_0001>

<bundles_post_ra>
// kernel: tpu_custom_call.1
= control target key start
LH: loop header
LB: loop body
LE: loop exit
PB: predicated region body
PF: predicated region fallthrough
CT: control target
= control target key end

     0   :  { %10 = vsyncpa [#allocation3], 0  ;;  %s3019_s0 = inlined_call_operand.vmem [shape: bf16[2,256,36], index: 0, kind: input, shape index: {}]   ;;  %s3020_s1 = inlined_call_operand.vmem [shape: bf16[36,512], index: 1, kind: input, shape index: {}]   ;;  %s3021_s2 = inlined_call_operand.hbm [shape: f32[1,512], index: 2, kind: input, shape index: {}]   ;;  %s3022_s3 = inlined_call_operand.vmem [shape: bf16[512,128], index: 3, kind: input, shape index: {}]   ;;  %s3023_s4 = inlined_call_operand.vmem [shape: f32[1,128], index: 4, kind: input, shape index: {}]   ;;  %s3024_s5 = inlined_call_operand.hbm [shape: f32[2,256,128], index: 5, kind: output, shape index: {}]  }
   0x1   :  { %11 = vsyncpa [#allocation4], 0 }
   0x2   :  { %13 = vsyncpa [#allocation4 + $0x1], 0  ;;  %s2442_s18 = smov 0   ;;  %s2444_s19 = smov 0  }
   0x3   :  { %s2446_s20 = smov 0   ;;  %s2448_s21 = smov 0  }
   0x4   :  { %s2450_s22 = smov 0   ;;  %s2452_s23 = smov 0  }
   0x5 LB: > { %s1826_s24 = sadd.s32 4294967295, %s2405_s23   ;;  %s1827_s25 = sadd.s32 4294967294, %s2405_s23   ;;  %s2405_s23 = sphi %s2452_s23, %s19_s23   ;;  %s2401_s22 = sphi %s2450_s22, %s3042_s22   ;;  %s2397_s21 = sphi %s2448_s21, %s3041_s21   ;;  %s2393_s20 = sphi %s2446_s20, %s3040_s20   ;;  %s2389_s19 = sphi %s2444_s19, %s3039_s19   ;;  %s2385_s18 = sphi %s2442_s18, %s3038_s18  }
   0x6   : > { %s31_s26 = sadd.s32 1, %s2401_s22  ;;  %s152_s27 = sadd.s32 1, %s2393_s20 }
   0x7   : > { %p33_p0 = scmp.ge.s32.totalorder %s31_s26, 2  ;;  %p162_p1 = scmp.ne.s32.totalorder %s2393_s20, %s2389_s19 }
   0x8   : > { %p163_p2 = scmp.eq.s32.totalorder %s1826_s24, 1  ;;  %p168_p3 = scmp.ne.s32.totalorder %s2389_s19, %s2385_s18 }
   0x9   : > { %s3044_s26 = smov (%p33_p0, %s31_s26), 0  ;;  %p169_p5 = scmp.eq.s32.totalorder %s1827_s25, 1 }
   0xa   : > { %p2482_p4 = por %p163_p2, %p162_p1  ;;  %s147_s29 = ssub.s32 %s2401_s22, %s3044_s26 }
   0xb   : > { %p1828_p6 = scmp.ge.s32.totalorder %s2405_s23, 1  ;;  %p150_p7 = scmp.eq.s32.totalorder %s147_s29, 0 }
   0xc   : > { %s3029_s28 = scalar_select %p2482_p4, 1, 0 }
   0xd   : > { %p2489_p8 = por %p169_p5, %p168_p3  ;;  %p176_p9 = scmp.lt.s32.totalorder %s2405_s23, 3 }
   0xe   : > { %s2495_s6 = scalar_select %p150_p7, %s2393_s20, %s152_s27  }
   0xf   : > { %s3030_s30 = scalar_select %p2489_p8, 1, 0 }
  0x10   : > { %p2497_p10 = pnand %p1828_p6, %p176_p9  ;;  %p2501_p11 = scmp.eq.s32.totalorder %s1826_s24, 0 }
  0x11   : > { %s2407_s9 = smov [#allocation2]   ;;  %s2295_s14 = scalar_lea.hbm %s3021_s2, 64 }
  0x12   : > { %s3031_s7 = scalar_select %p2497_p10, 1, 0 }
  0x13   : > { %s3032_s8 = scalar_select %p2501_p11, 1, 0 }
  0x14   : > { %p2168_p12 = pneg %p2497_p10  ;;  %s192_s10 = sshll.u32 %s2407_s9, 4  ;;  %s193_s10 = int_to_ptr.vmem [resolvable:$true] %s192_s10 }
  0x15   : > { %p2296_p0 = scmp.ne.s32.totalorder %s3021_s2, %s2295_s14  ;;  %p2302_p5 = scmp.lt.u32.totalorder %s2295_s14, %s3021_s2 }
  0x16   : > { %p2509_p13 = pnand %p2501_p11, %p2168_p12 }
  0x18   : > { %p2297_p1 = pneg %p2509_p13 }
  0x1a   : > { %p2298_p2 = pnand %p2297_p1, %p2296_p0 }
  0x1c   : > { %p2299_p3 = pneg %p2298_p2 }
  0x1e   : > { %p2304_p6 = pnand %p2302_p5, %p2299_p3 }
  0x20   : > { %2307 = shalt.err (!%p2304_p6)
}
  0x21   : > { %s2308_s25 = scalar_lea.vmem %s193_s10, 64  ;;  %p2316_p8 = scmp.lt.s32.totalorder %s193_s10, %s193_s10 }
  0x22   : > { %p2309_p7 = scmp.ne.s32.totalorder %s193_s10, %s2308_s25  ;;  %p2317_p4 = scmp.lt.s32.totalorder %s2308_s25, %s2308_s25 }
  0x24   : > { %p2311_p9 = pnand %p2309_p7, %p2297_p1  ;;  %p2318_p11 = por %p2317_p4, %p2316_p8 }
  0x26   : > { %p2312_p12 = pneg %p2311_p9 }
  0x28   : > { %p2319_p10 = pnand %p2318_p11, %p2312_p12 }
  0x2a   : > { %2322 = shalt.err (!%p2319_p10)
}
  0x2b   : > { %2171 = dma.hbm_to_vmem [thread:$0]  (!%p2509_p13), %s3021_s2, 64, %s193_s10, [#allocation3]  }
  0x2c   : > { %p3034_p0 = scmp.ne.s32.totalorder %s3031_s7, 0 }
  0x2d   : > { %p3035_p2 = scmp.ne.s32.totalorder (!%p3034_p0), %s3032_s8, 0 }
  0x2e   : > { %224 = sbr.rel (%p3034_p0) target bundleno = 646 (0x286), region = 40 }
  0x35   : > { %2376 = dma.done.wait (%p3035_p2), [#allocation3], 64  }
  0x36   : > { %2378 = vsyncadd (%p3035_p2), [#allocation3], 4294967232  ;;  %v2408_v0 = vmov 0   ;;  %p257_p4 = scmp.lt.s32.totalorder %s2397_s21, 1  ;;  %v2231_v1 = vld [vmem:[%s3020_s1 + $0x4] ss:$16 sps:$4 sm:$0xff]  }
  0x37   : > { %556 = vmatprep.mubr.bf16.mxu0 %v2408_v0  ;;  %749 = vmatprep.mubr.bf16.mxu1 %v2408_v0  ;;  %v2233_v2 = vld [vmem:[%s3020_s1 + $0xc] ss:$16 sps:$4 sm:$0xff]   ;;  %v2235_v3 = vld [vmem:[%s3020_s1] ss:$16 sps:$4 sm:$0xff]   ;;  %v2236_v4 = vld [vmem:[%s3020_s1 + $0x8] ss:$16 sps:$4 sm:$0xff]  }
  0x38   : > { %s258_s9 = scalar_select %p257_p4, %s2397_s21, 1  ;;  %524 = vmatprep.subr.bf16.mxu0 %v2231_v1  ;;  %717 = vmatprep.subr.bf16.mxu1 %v2233_v2  ;;  %v2237_v5 = vld [vmem:[%s3020_s1 + $0x24] ss:$16 sps:$4 sm:$0xff]   ;;  %v2239_v6 = vld [vmem:[%s3020_s1 + $0x2c] ss:$16 sps:$4 sm:$0xff]   ;;  %vm511_vm0 = vcmask 1041408   ;;  %v312_v2 = vlaneseq }
  0x39   : > { %525 = vmatpush1.bf16.msra.mxu0 %v2235_v3  ;;  %718 = vmatpush1.bf16.msra.mxu1 %v2236_v4  ;;  %v2241_v7 = vld [vmem:[%s3020_s1 + $0x20] ss:$16 sps:$4 sm:$0xff]   ;;  %v2242_v8 = vld [vmem:[%s3020_s1 + $0x28] ss:$16 sps:$4 sm:$0xff]   ;;  %vm462_vm1 = vcmask 293888   ;;  %s1937_s14 = sshll.u32 %s2397_s21, 12 }
  0x3a   : > { %s1936_s16 = sshll.u32 %s258_s9, 7  ;;  %526 = vmatprep.subr.bf16.mxu0 %v2237_v5  ;;  %v308_v9 = vld [vmem:[%s3020_s1 + $0x40] sm:$0x33]  ;;  %v309_v10 = vld [vmem:[%s3020_s1 + $0x48] sm:$0x33]  ;;  %719 = vmatprep.subr.bf16.mxu1 %v2239_v6  ;;  %v2271_v28 = vld [vmem:[%s3022_s3 + $0x50] sm:$0xff]   ;;  %s2965_s25 = scalar_lea.hbm %s3024_s5, %s1937_s14 }
  0x3b   : > { %s2572_s17 = scalar_lea.vmem %s3019_s0, %s1936_s16  ;;  %v1861_v11 = vcombine.high %v308_v9, %v308_v9  ;;  %v1863_v12 = vcombine.high %v309_v10, %v309_v10  ;;  %v1860_v13 = vcombine.low %v308_v9, %v308_v9  ;;  %v1862_v14 = vcombine.low %v309_v10, %v309_v10  ;;  %v2259_v19 = vld [vmem:[%s3022_s3 + $0x40] sm:$0xff]   ;;  %v2265_v24 = vld [vmem:[%s3022_s3 + $0x48] sm:$0xff]   ;;  %v2272_v29 = vld [vmem:[%s3022_s3 + $0x10] sm:$0xff]   ;;  %p3036_p10 = scmp.ne.s32.totalorder %s3029_s28, 0 }
  0x3c   : > { %v2247_v17 = vld [vmem:[%s2572_s17] sm:$0xff]   ;;  %v2248_v18 = vld [vmem:[%s2572_s17 + $0x8] sm:$0xff]   ;;  %v2249_v23 = vld [vmem:[%s2572_s17 + $0x10] sm:$0xff]   ;;  %v313_v3 = vshrl.u32 %v312_v2, 7  ;;  %s2409_s29 = smov [#allocation5]  }
  0x3d   : > { %527 = vmatpush1.bf16.msra.mxu0 %v2241_v7  ;;  %720 = vmatpush1.bf16.msra.mxu1 %v2242_v8  ;;  %v513_v15 = vsel %vm511_vm0, %v1860_v13, 0  ;;  %v519_v16 = vsel %vm511_vm0, %v1862_v14, 0  ;;  %v2260_v20 = vld [vmem:[%s3022_s3] sm:$0xff]   ;;  %v2266_v25 = vld [vmem:[%s3022_s3 + $0x8] sm:$0xff]   ;;  %v2250_v30 = vld [vmem:[%s2572_s17 + $0x18] sm:$0xff]   ;;  %s2327_s11 = sshll.u32 %s2409_s29, 4  ;;  %s2328_s11 = int_to_ptr.vmem [resolvable:$false] %s2327_s11 }
  0x3e   : > { %1864 = vmatprep.subr.msk.bf16.mxu0 %vm511_vm0, %v1861_v11  ;;  %1881 = vmatprep.subr.msk.bf16.mxu1 %vm511_vm0, %v1863_v12  ;;  %v2261_v21 = vld [vmem:[%s3022_s3 + $0xc0] sm:$0xff]   ;;  %v2267_v26 = vld [vmem:[%s3022_s3 + $0xc8] sm:$0xff]   ;;  %v2273_v31 = vld [vmem:[%s3022_s3 + $0xd0] sm:$0xff]   ;;  %v314_v4 = vsub.s32 0, %v313_v3  ;;  %v322_v5 = vsub.s32 2, %v313_v3  ;;  %v318_v7 = vsub.s32 1, %v313_v3 }
  0x3f   : > { %v2263_v22 = vld [vmem:[%s3022_s3 + $0x80] sm:$0xff]   ;;  %v2269_v27 = vld [vmem:[%s3022_s3 + $0x88] sm:$0xff]   ;;  %v2274_v32 = vld [vmem:[%s3022_s3 + $0x90] sm:$0xff]   ;;  %v326_v8 = vsub.s32 3, %v313_v3  ;;  %s2329_s10 = scalar_lea.vmem %s2328_s11, 8192 }
  0x40   : > { %v2275_v33 = vld [vmem:[%s3022_s3 + $0x58] sm:$0xff]   ;;  %v2279_v37 = vld [vmem:[%s3022_s3 + $0x60] sm:$0xff]   ;;  %v2283_v42 = vld [vmem:[%s3022_s3 + $0x68] sm:$0xff]  }
  0x41   : > { %529 = vmatpush1.bf16.msra.mxu0 %v513_v15  ;;  %722 = vmatpush1.bf16.msra.mxu1 %v519_v16  ;;  %v2276_v34 = vld [vmem:[%s3022_s3 + $0x18] sm:$0xff]   ;;  %v2280_v38 = vld [vmem:[%s3022_s3 + $0x20] sm:$0xff]   ;;  %v2284_v43 = vld [vmem:[%s3022_s3 + $0x28] sm:$0xff]  }
  0x42   : > { %1938 = vmatprep.subr.bf16.mxu0 %v2259_v19  ;;  %2050 = vmatprep.subr.bf16.mxu1 %v2261_v21  ;;  %v2277_v35 = vld [vmem:[%s3022_s3 + $0xd8] sm:$0xff]   ;;  %v2251_v39 = vld [vmem:[%s2572_s17 + $0x20] sm:$0xff]   ;;  %v2285_v44 = vld [vmem:[%s3022_s3 + $0xe8] sm:$0xff]  }
  0x43   : > { %v2278_v36 = vld [vmem:[%s3022_s3 + $0x98] sm:$0xff]   ;;  %v2281_v40 = vld [vmem:[%s3022_s3 + $0xe0] sm:$0xff]   ;;  %v2286_v45 = vld [vmem:[%s3022_s3 + $0xa8] sm:$0xff]  }
  0x44   : > { %1865 = vmatmul.mubr.msk.bf16.vlgmr.msra.gmra.mrb[0].mxu0 %vm462_vm1, %v2247_v17  ;;  %1882 = vmatmul.mubr.msk.bf16.vlgmr.msra.gmra.mrb[0].mxu1 %vm462_vm1, %v2247_v17  ;;  %v2282_v41 = vld [vmem:[%s3022_s3 + $0xa0] sm:$0xff]   ;;  %v2287_v46 = vld [vmem:[%s3022_s3 + $0x70] sm:$0xff]   ;;  %v2252_v48 = vld [vmem:[%s2572_s17 + $0x28] sm:$0xff]  }
  0x45   : > { %566 = vmatprep.mubr.bf16.mxu0 %v2408_v0  ;;  %759 = vmatprep.mubr.bf16.mxu1 %v2408_v0  ;;  %v2288_v47 = vld [vmem:[%s3022_s3 + $0x30] sm:$0xff]   ;;  %v2291_v51 = vld [vmem:[%s3022_s3 + $0x78] sm:$0xff]   ;;  %v2255_v57 = vld [vmem:[%s2572_s17 + $0x40] sm:$0xff]  }
  0x46   : > { %1939 = vmatpush3.bf16.msra.mxu0 %v2260_v20  ;;  %2051 = vmatpush3.bf16.msra.mxu1 %v2263_v22  ;;  %v2289_v49 = vld [vmem:[%s3022_s3 + $0xf0] sm:$0xff]   ;;  %v2292_v52 = vld [vmem:[%s3022_s3 + $0x38] sm:$0xff]   ;;  %v2256_v58 = vld [vmem:[%s2572_s17 + $0x48] sm:$0xff]  }
  0x47   : > { %1940 = vmatprep.subr.bf16.mxu0 %v2265_v24  ;;  %2052 = vmatprep.subr.bf16.mxu1 %v2267_v26  ;;  %v2290_v50 = vld [vmem:[%s3022_s3 + $0xb0] sm:$0xff]   ;;  %v2293_v53 = vld [vmem:[%s3022_s3 + $0xf8] sm:$0xff]   ;;  %v2262_v61 = vld [vmem:[%s2572_s17 + $0x60] sm:$0xff]  }
  0x48   : > { %v2294_v54 = vld [vmem:[%s3022_s3 + $0xb8] sm:$0xff]   ;;  %v2253_v55 = vld [vmem:[%s2572_s17 + $0x30] sm:$0xff]   ;;  %v2264_v62 = vld [vmem:[%s2572_s17 + $0x68] sm:$0xff]  }
  0x49   : > { %v2254_v56 = vld [vmem:[%s2572_s17 + $0x38] sm:$0xff]   ;;  %v2257_v59 = vld [vmem:[%s2572_s17 + $0x50] sm:$0xff]   ;;  %v310_v6 = vld [vmem:[#allocation2] sm:$0xf] }
  0x4a   : > { %1941 = vmatpush3.bf16.msra.mxu0 %v2266_v25  ;;  %2053 = vmatpush3.bf16.msra.mxu1 %v2269_v27  ;;  %v2258_v60 = vld [vmem:[%s2572_s17 + $0x58] sm:$0xff]   ;;  %v2268_v63 = vld [vmem:[%s2572_s17 + $0x70] sm:$0xff]   ;;  %v2752_v9 = vrot.slane %v310_v6, %v314_v4  ;;  %v2754_v10 = vrot.slane %v310_v6, %v322_v5  ;;  %v2756_v11 = vrot.slane %v310_v6, %v318_v7 }
  0x4b   : > { %1942 = vmatprep.subr.bf16.mxu0 %v2271_v28  ;;  %2054 = vmatprep.subr.bf16.mxu1 %v2273_v31  ;;  %v2270_v1 = vld [vmem:[%s2572_s17 + $0x78] sm:$0xff]   ;;  %v2758_v12 = vrot.slane %v310_v6, %v326_v8  ;;  %s253_s17 = sand.u32 1, %s2389_s19  }
  0x4c   : > { %1866 = vmatmul.mubr.msk.bf16.gmra.mrb[4].mxu0 %vm462_vm1, %v2248_v18  ;;  %1883 = vmatmul.mubr.msk.bf16.gmra.mrb[4].mxu1 %vm462_vm1, %v2248_v18  ;;  %s1833_s8 = sshll.u32 %s253_s17, 8  ;;  %s2973_s27 = scalar_lea.sflag [#allocation4], %s253_s17 }
  0x4d   : > { %576 = vmatprep.mubr.bf16.mxu0 %v2408_v0  ;;  %769 = vmatprep.mubr.bf16.mxu1 %v2408_v0  ;;  %s2898_s13 = scalar_lea.vmem [#allocation5], %s1833_s8 }
  0x4e   : > { %1943 = vmatpush3.bf16.msra.mxu0 %v2272_v29  ;;  %2055 = vmatpush3.bf16.msra.mxu1 %v2274_v32  ;;  %s1735_s15 = sshll.u32 %s2898_s13, 4  ;;  %s2967_s15 = int_to_ptr.vmem [resolvable:$true] %s1735_s15 }
  0x4f   : > { %1944 = vmatprep.subr.bf16.mxu0 %v2275_v33  ;;  %2056 = vmatprep.subr.bf16.mxu1 %v2277_v35  ;;  %s2323_s21 = scalar_lea.vmem %s2967_s15, 4096  ;;  %p2330_p1 = scmp.lt.s32.totalorder %s2967_s15, %s2328_s11 }
  0x50   : > { %p2324_p8 = scmp.ne.s32.totalorder %s2967_s15, %s2323_s21  ;;  %p2331_p3 = scmp.lt.s32.totalorder %s2329_s10, %s2323_s21 }
  0x52   : > { %1945 = vmatpush3.bf16.msra.mxu0 %v2276_v34  ;;  %2057 = vmatpush3.bf16.msra.mxu1 %v2278_v36  ;;  %p2325_p11 = pnand %p2324_p8, %p3036_p10  ;;  %p2332_p5 = por %p2331_p3, %p2330_p1 }
  0x53   : > { %1946 = vmatprep.subr.bf16.mxu0 %v2279_v37  ;;  %2058 = vmatprep.subr.bf16.mxu1 %v2281_v40 }
  0x54   : > { %1867 = vmatmul.mubr.msk.bf16.gmra.mrb[8].mxu0 %vm462_vm1, %v2249_v23  ;;  %1884 = vmatmul.mubr.msk.bf16.gmra.mrb[8].mxu1 %vm462_vm1, %v2249_v23  ;;  %p2326_p13 = pneg %p2325_p11 }
  0x55   : > { %586 = vmatprep.mubr.bf16.mxu0 %v2408_v0  ;;  %779 = vmatprep.mubr.bf16.mxu1 %v2408_v0 }
  0x56   : > { %1947 = vmatpush3.bf16.msra.mxu0 %v2280_v38  ;;  %2059 = vmatpush3.bf16.msra.mxu1 %v2282_v41  ;;  %p2333_p6 = pnand %p2332_p5, %p2326_p13 }
  0x57   : > { %1948 = vmatprep.subr.bf16.mxu0 %v2283_v42  ;;  %2060 = vmatprep.subr.bf16.mxu1 %v2285_v44 }
  0x5a   : > { %1949 = vmatpush3.bf16.msra.mxu0 %v2284_v43  ;;  %2061 = vmatpush3.bf16.msra.mxu1 %v2286_v45 }
  0x5b   : > { %1950 = vmatprep.subr.bf16.mxu0 %v2287_v46  ;;  %2062 = vmatprep.subr.bf16.mxu1 %v2289_v49 }
  0x5c   : > { %1868 = vmatmul.mubr.msk.bf16.gmra.mrb[12].mxu0 %vm462_vm1, %v2250_v30  ;;  %1885 = vmatmul.mubr.msk.bf16.gmra.mrb[12].mxu1 %vm462_vm1, %v2250_v30 }
  0x5d   : > { %596 = vmatprep.mubr.bf16.mxu0 %v2408_v0  ;;  %789 = vmatprep.mubr.bf16.mxu1 %v2408_v0 }
  0x5e   : > { %1951 = vmatpush3.bf16.msra.mxu0 %v2288_v47  ;;  %2063 = vmatpush3.bf16.msra.mxu1 %v2290_v50 }
  0x5f   : > { %1952 = vmatprep.subr.bf16.mxu0 %v2291_v51  ;;  %2064 = vmatprep.subr.bf16.mxu1 %v2293_v53 }
  0x62   : > { %1953 = vmatpush3.bf16.msra.mxu0 %v2292_v52  ;;  %2065 = vmatpush3.bf16.msra.mxu1 %v2294_v54 }
  0x64   : > { %1869 = vmatmul.mubr.msk.bf16.gmra.mrb[16].mxu0 %vm462_vm1, %v2251_v39  ;;  %1886 = vmatmul.mubr.msk.bf16.gmra.mrb[16].mxu1 %vm462_vm1, %v2251_v39 }
  0x65   : > { %606 = vmatprep.mubr.bf16.mxu0 %v2408_v0  ;;  %799 = vmatprep.mubr.bf16.mxu1 %v2408_v0 }
  0x6c   : > { %1870 = vmatmul.mubr.msk.bf16.gmra.mrb[20].mxu0 %vm462_vm1, %v2252_v48  ;;  %1887 = vmatmul.mubr.msk.bf16.gmra.mrb[20].mxu1 %vm462_vm1, %v2252_v48 }
  0x6d   : > { %616 = vmatprep.mubr.bf16.mxu0 %v2408_v0  ;;  %809 = vmatprep.mubr.bf16.mxu1 %v2408_v0 }
  0x74   : > { %1871 = vmatmul.mubr.msk.bf16.gmra.mrb[24].mxu0 %vm462_vm1, %v2253_v55  ;;  %1888 = vmatmul.mubr.msk.bf16.gmra.mrb[24].mxu1 %vm462_vm1, %v2253_v55 }
  0x75   : > { %626 = vmatprep.mubr.bf16.mxu0 %v2408_v0  ;;  %819 = vmatprep.mubr.bf16.mxu1 %v2408_v0 }
  0x7c   : > { %1872 = vmatmul.mubr.msk.bf16.gmra.mrb[28].mxu0 %vm462_vm1, %v2254_v56  ;;  %1889 = vmatmul.mubr.msk.bf16.gmra.mrb[28].mxu1 %vm462_vm1, %v2254_v56 }
  0x7d   : > { %636 = vmatprep.mubr.bf16.mxu0 %v2408_v0  ;;  %829 = vmatprep.mubr.bf16.mxu1 %v2408_v0 }
  0x84   : > { %1873 = vmatmul.mubr.msk.bf16.gmra.mrb[32].mxu0 %vm462_vm1, %v2255_v57  ;;  %1890 = vmatmul.mubr.msk.bf16.gmra.mrb[32].mxu1 %vm462_vm1, %v2255_v57 }
  0x85   : > { %646 = vmatprep.mubr.bf16.mxu0 %v2408_v0  ;;  %839 = vmatprep.mubr.bf16.mxu1 %v2408_v0 }
  0x8c   : > { %1874 = vmatmul.mubr.msk.bf16.gmra.mrb[36].mxu0 %vm462_vm1, %v2256_v58  ;;  %1891 = vmatmul.mubr.msk.bf16.gmra.mrb[36].mxu1 %vm462_vm1, %v2256_v58 }
  0x8d   : > { %656 = vmatprep.mubr.bf16.mxu0 %v2408_v0  ;;  %849 = vmatprep.mubr.bf16.mxu1 %v2408_v0 }
  0x94   : > { %1875 = vmatmul.mubr.msk.bf16.gmra.mrb[40].mxu0 %vm462_vm1, %v2257_v59  ;;  %1892 = vmatmul.mubr.msk.bf16.gmra.mrb[40].mxu1 %vm462_vm1, %v2257_v59 }
  0x95   : > { %666 = vmatprep.mubr.bf16.mxu0 %v2408_v0  ;;  %859 = vmatprep.mubr.bf16.mxu1 %v2408_v0 }
  0x9c   : > { %1876 = vmatmul.mubr.msk.bf16.gmra.mrb[44].mxu0 %vm462_vm1, %v2258_v60  ;;  %1893 = vmatmul.mubr.msk.bf16.gmra.mrb[44].mxu1 %vm462_vm1, %v2258_v60 }
  0x9d   : > { %676 = vmatprep.mubr.bf16.mxu0 %v2408_v0  ;;  %869 = vmatprep.mubr.bf16.mxu1 %v2408_v0 }
  0xa4   : > { %1877 = vmatmul.mubr.msk.bf16.gmra.mrb[48].mxu0 %vm462_vm1, %v2262_v61  ;;  %1894 = vmatmul.mubr.msk.bf16.gmra.mrb[48].mxu1 %vm462_vm1, %v2262_v61 }
  0xa5   : > { %686 = vmatprep.mubr.bf16.mxu0 %v2408_v0  ;;  %879 = vmatprep.mubr.bf16.mxu1 %v2408_v0 }
  0xac   : > { %1878 = vmatmul.mubr.msk.bf16.gmra.mrb[52].mxu0 %vm462_vm1, %v2264_v62  ;;  %1895 = vmatmul.mubr.msk.bf16.gmra.mrb[52].mxu1 %vm462_vm1, %v2264_v62 }
  0xad   : > { %696 = vmatprep.mubr.bf16.mxu0 %v2408_v0  ;;  %889 = vmatprep.mubr.bf16.mxu1 %v2408_v0 }
  0xb4   : > { %1879 = vmatmul.mubr.msk.bf16.gmra.mrb[56].mxu0 %vm462_vm1, %v2268_v63  ;;  %1896 = vmatmul.mubr.msk.bf16.gmra.mrb[56].mxu1 %vm462_vm1, %v2268_v63 }
  0xb5   : > { %706 = vmatprep.mubr.bf16.mxu0 %v2408_v0  ;;  %899 = vmatprep.mubr.bf16.mxu1 %v2408_v0 }
  0xbc   : > { %1880 = vmatmul.mubr.msk.bf16.gmra.mrb[60].mxu0 %vm462_vm1, %v2270_v1  ;;  %1897 = vmatmul.mubr.msk.bf16.gmra.mrb[60].mxu1 %vm462_vm1, %v2270_v1 }
 0x117   : > { %v558_v0 = vpop.f32.mrb[0].mxu0  ;;  %v751_v13 = vpop.f32.mrb[0].mxu1 }
 0x118   : > { %v559_v14 = vadd.f32 %v558_v0, %v2752_v9  ;;  %v752_v15 = vadd.f32 %v751_v13, %v2754_v10  ;;  %v560_v16 = vpop.f32.mrb[1].mxu0  ;;  %v753_v17 = vpop.f32.mrb[1].mxu1 }
 0x119   : > { %v561_v18 = vadd.f32 %v560_v16, %v2756_v11  ;;  %v754_v19 = vadd.f32 %v753_v17, %v2758_v12  ;;  %v562_v20 = vpop.f32.mrb[2].mxu0  ;;  %v755_v21 = vpop.f32.mrb[2].mxu1 }
 0x11a   : > { %v912_v22 = vmax.f32 %v752_v15, 0.0  ;;  %v563_v23 = vadd.f32 %v562_v20, %v2752_v9  ;;  %v756_v24 = vadd.f32 %v755_v21, %v2754_v10  ;;  %v564_v25 = vpop.f32.mrb[3].mxu0  ;;  %v757_v26 = vpop.f32.mrb[3].mxu1  ;;  %v910_v30 = vmax.f32 %v559_v14, 0.0 }
 0x11b   : > { %v913_v27 = vmax.f32 %v754_v19, 0.0  ;;  %v565_v28 = vadd.f32 %v564_v25, %v2756_v11  ;;  %v758_v29 = vadd.f32 %v757_v26, %v2758_v12  ;;  %v911_v33 = vmax.f32 %v561_v18, 0.0 }
 0x11c   : > { %v914_v31 = vmax.f32 %v563_v23, 0.0  ;;  %v916_v32 = vmax.f32 %v756_v24, 0.0 }
 0x11d   : > { %v915_v34 = vmax.f32 %v565_v28, 0.0  ;;  %v917_v35 = vmax.f32 %v758_v29, 0.0 }
 0x11e   : > { %v1038_v36 = vpack.c.bf16 %v914_v31, %v910_v30  ;;  %v1040_v37 = vpack.c.bf16 %v916_v32, %v912_v22 }
 0x11f   : > { %v1039_v38 = vpack.c.bf16 %v915_v34, %v911_v33  ;;  %v1041_v39 = vpack.c.bf16 %v917_v35, %v913_v27  ;;  %v568_v40 = vpop.f32.mrb[4].mxu0  ;;  %v761_v41 = vpop.f32.mrb[4].mxu1 }
 0x120   : > { %v569_v42 = vadd.f32 %v568_v40, %v2752_v9  ;;  %v762_v43 = vadd.f32 %v761_v41, %v2754_v10  ;;  %v570_v44 = vpop.f32.mrb[5].mxu0  ;;  %v763_v45 = vpop.f32.mrb[5].mxu1 }
 0x121   : > { %v571_v46 = vadd.f32 %v570_v44, %v2756_v11  ;;  %v764_v47 = vadd.f32 %v763_v45, %v2758_v12  ;;  %v572_v48 = vpop.f32.mrb[6].mxu0  ;;  %v765_v49 = vpop.f32.mrb[6].mxu1  ;;  %1397 = vmatprep.mubr.bf16.mxu0 %v1039_v38  ;;  %1558 = vmatprep.mubr.bf16.mxu1 %v1041_v39 }
 0x122   : > { %v920_v50 = vmax.f32 %v762_v43, 0.0  ;;  %v573_v51 = vadd.f32 %v572_v48, %v2752_v9  ;;  %v766_v52 = vadd.f32 %v765_v49, %v2754_v10  ;;  %v574_v53 = vpop.f32.mrb[7].mxu0  ;;  %v767_v54 = vpop.f32.mrb[7].mxu1  ;;  %1398 = vmatmul.mubr.bf16.vlgmr.msra.gmra.mrb[64].mxu0 %v1038_v36  ;;  %1559 = vmatmul.mubr.bf16.vlgmr.msra.gmra.mrb[64].mxu1 %v1040_v37  ;;  %v918_v58 = vmax.f32 %v569_v42, 0.0 }
 0x123   : > { %v921_v55 = vmax.f32 %v764_v47, 0.0  ;;  %v575_v56 = vadd.f32 %v574_v53, %v2756_v11  ;;  %v768_v57 = vadd.f32 %v767_v54, %v2758_v12  ;;  %v919_v61 = vmax.f32 %v571_v46, 0.0 }
 0x124   : > { %v922_v59 = vmax.f32 %v573_v51, 0.0  ;;  %v924_v60 = vmax.f32 %v766_v52, 0.0 }
 0x125   : > { %v923_v62 = vmax.f32 %v575_v56, 0.0  ;;  %v925_v63 = vmax.f32 %v768_v57, 0.0 }
 0x126   : > { %v1042_v1 = vpack.c.bf16 %v922_v59, %v918_v58  ;;  %v1044_v2 = vpack.c.bf16 %v924_v60, %v920_v50 }
 0x127   : > { %v1043_v3 = vpack.c.bf16 %v923_v62, %v919_v61  ;;  %v1045_v4 = vpack.c.bf16 %v925_v63, %v921_v55  ;;  %v578_v5 = vpop.f32.mrb[8].mxu0  ;;  %v771_v6 = vpop.f32.mrb[8].mxu1 }
 0x128   : > { %v579_v7 = vadd.f32 %v578_v5, %v2752_v9  ;;  %v772_v8 = vadd.f32 %v771_v6, %v2754_v10  ;;  %v580_v0 = vpop.f32.mrb[9].mxu0  ;;  %v773_v13 = vpop.f32.mrb[9].mxu1 }
 0x129   : > { %v581_v14 = vadd.f32 %v580_v0, %v2756_v11  ;;  %v774_v15 = vadd.f32 %v773_v13, %v2758_v12  ;;  %v582_v16 = vpop.f32.mrb[10].mxu0  ;;  %v775_v17 = vpop.f32.mrb[10].mxu1  ;;  %1405 = vmatprep.mubr.bf16.mxu0 %v1043_v3  ;;  %1566 = vmatprep.mubr.bf16.mxu1 %v1045_v4 }
 0x12a   : > { %v928_v18 = vmax.f32 %v772_v8, 0.0  ;;  %v583_v19 = vadd.f32 %v582_v16, %v2752_v9  ;;  %v776_v20 = vadd.f32 %v775_v17, %v2754_v10  ;;  %v584_v21 = vpop.f32.mrb[11].mxu0  ;;  %v777_v22 = vpop.f32.mrb[11].mxu1  ;;  %1406 = vmatmul.mubr.bf16.gmra.mrb[68].mxu0 %v1042_v1  ;;  %1567 = vmatmul.mubr.bf16.gmra.mrb[68].mxu1 %v1044_v2  ;;  %v926_v26 = vmax.f32 %v579_v7, 0.0 }
 0x12b   : > { %v929_v23 = vmax.f32 %v774_v15, 0.0  ;;  %v585_v24 = vadd.f32 %v584_v21, %v2756_v11  ;;  %v778_v25 = vadd.f32 %v777_v22, %v2758_v12  ;;  %v927_v29 = vmax.f32 %v581_v14, 0.0 }
 0x12c   : > { %v930_v27 = vmax.f32 %v583_v19, 0.0  ;;  %v932_v28 = vmax.f32 %v776_v20, 0.0 }
 0x12d   : > { %v931_v30 = vmax.f32 %v585_v24, 0.0  ;;  %v933_v31 = vmax.f32 %v778_v25, 0.0 }
 0x12e   : > { %v1046_v32 = vpack.c.bf16 %v930_v27, %v926_v26  ;;  %v1048_v33 = vpack.c.bf16 %v932_v28, %v928_v18 }
 0x12f   : > { %v1047_v34 = vpack.c.bf16 %v931_v30, %v927_v29  ;;  %v1049_v35 = vpack.c.bf16 %v933_v31, %v929_v23  ;;  %v588_v36 = vpop.f32.mrb[12].mxu0  ;;  %v781_v37 = vpop.f32.mrb[12].mxu1 }
 0x130   : > { %v589_v38 = vadd.f32 %v588_v36, %v2752_v9  ;;  %v782_v39 = vadd.f32 %v781_v37, %v2754_v10  ;;  %v590_v40 = vpop.f32.mrb[13].mxu0  ;;  %v783_v41 = vpop.f32.mrb[13].mxu1 }
 0x131   : > { %v591_v42 = vadd.f32 %v590_v40, %v2756_v11  ;;  %v784_v43 = vadd.f32 %v783_v41, %v2758_v12  ;;  %v592_v44 = vpop.f32.mrb[14].mxu0  ;;  %v785_v45 = vpop.f32.mrb[14].mxu1  ;;  %1413 = vmatprep.mubr.bf16.mxu0 %v1047_v34  ;;  %1574 = vmatprep.mubr.bf16.mxu1 %v1049_v35 }
 0x132   : > { %v936_v46 = vmax.f32 %v782_v39, 0.0  ;;  %v593_v47 = vadd.f32 %v592_v44, %v2752_v9  ;;  %v786_v48 = vadd.f32 %v785_v45, %v2754_v10  ;;  %v594_v49 = vpop.f32.mrb[15].mxu0  ;;  %v787_v50 = vpop.f32.mrb[15].mxu1  ;;  %1414 = vmatmul.mubr.bf16.gmra.mrb[72].mxu0 %v1046_v32  ;;  %1575 = vmatmul.mubr.bf16.gmra.mrb[72].mxu1 %v1048_v33  ;;  %v934_v54 = vmax.f32 %v589_v38, 0.0 }
 0x133   : > { %v937_v51 = vmax.f32 %v784_v43, 0.0  ;;  %v595_v52 = vadd.f32 %v594_v49, %v2756_v11  ;;  %v788_v53 = vadd.f32 %v787_v50, %v2758_v12  ;;  %v935_v57 = vmax.f32 %v591_v42, 0.0 }
 0x134   : > { %v938_v55 = vmax.f32 %v593_v47, 0.0  ;;  %v940_v56 = vmax.f32 %v786_v48, 0.0 }
 0x135   : > { %v939_v58 = vmax.f32 %v595_v52, 0.0  ;;  %v941_v59 = vmax.f32 %v788_v53, 0.0 }
 0x136   : > { %v1050_v60 = vpack.c.bf16 %v938_v55, %v934_v54  ;;  %v1052_v61 = vpack.c.bf16 %v940_v56, %v936_v46 }
 0x137   : > { %v1051_v62 = vpack.c.bf16 %v939_v58, %v935_v57  ;;  %v1053_v63 = vpack.c.bf16 %v941_v59, %v937_v51  ;;  %v598_v1 = vpop.f32.mrb[16].mxu0  ;;  %v791_v2 = vpop.f32.mrb[16].mxu1 }
 0x138   : > { %v599_v3 = vadd.f32 %v598_v1, %v2752_v9  ;;  %v792_v4 = vadd.f32 %v791_v2, %v2754_v10  ;;  %v600_v5 = vpop.f32.mrb[17].mxu0  ;;  %v793_v6 = vpop.f32.mrb[17].mxu1 }
 0x139   : > { %v601_v7 = vadd.f32 %v600_v5, %v2756_v11  ;;  %v794_v8 = vadd.f32 %v793_v6, %v2758_v12  ;;  %v602_v0 = vpop.f32.mrb[18].mxu0  ;;  %v795_v13 = vpop.f32.mrb[18].mxu1  ;;  %1421 = vmatprep.mubr.bf16.mxu0 %v1051_v62  ;;  %1582 = vmatprep.mubr.bf16.mxu1 %v1053_v63 }
 0x13a   : > { %v944_v14 = vmax.f32 %v792_v4, 0.0  ;;  %v603_v15 = vadd.f32 %v602_v0, %v2752_v9  ;;  %v796_v16 = vadd.f32 %v795_v13, %v2754_v10  ;;  %v604_v17 = vpop.f32.mrb[19].mxu0  ;;  %v797_v18 = vpop.f32.mrb[19].mxu1  ;;  %1422 = vmatmul.mubr.bf16.gmra.mrb[76].mxu0 %v1050_v60  ;;  %1583 = vmatmul.mubr.bf16.gmra.mrb[76].mxu1 %v1052_v61  ;;  %v942_v22 = vmax.f32 %v599_v3, 0.0 }
 0x13b   : > { %v945_v19 = vmax.f32 %v794_v8, 0.0  ;;  %v605_v20 = vadd.f32 %v604_v17, %v2756_v11  ;;  %v798_v21 = vadd.f32 %v797_v18, %v2758_v12  ;;  %v943_v25 = vmax.f32 %v601_v7, 0.0 }
 0x13c   : > { %v946_v23 = vmax.f32 %v603_v15, 0.0  ;;  %v948_v24 = vmax.f32 %v796_v16, 0.0 }
 0x13d   : > { %v947_v26 = vmax.f32 %v605_v20, 0.0  ;;  %v949_v27 = vmax.f32 %v798_v21, 0.0 }
 0x13e   : > { %v1054_v28 = vpack.c.bf16 %v946_v23, %v942_v22  ;;  %v1056_v29 = vpack.c.bf16 %v948_v24, %v944_v14 }
 0x13f   : > { %v1055_v30 = vpack.c.bf16 %v947_v26, %v943_v25  ;;  %v1057_v31 = vpack.c.bf16 %v949_v27, %v945_v19  ;;  %v608_v32 = vpop.f32.mrb[20].mxu0  ;;  %v801_v33 = vpop.f32.mrb[20].mxu1 }
 0x140   : > { %v609_v34 = vadd.f32 %v608_v32, %v2752_v9  ;;  %v802_v35 = vadd.f32 %v801_v33, %v2754_v10  ;;  %v610_v36 = vpop.f32.mrb[21].mxu0  ;;  %v803_v37 = vpop.f32.mrb[21].mxu1 }
 0x141   : > { %v611_v38 = vadd.f32 %v610_v36, %v2756_v11  ;;  %v804_v39 = vadd.f32 %v803_v37, %v2758_v12  ;;  %v612_v40 = vpop.f32.mrb[22].mxu0  ;;  %v805_v41 = vpop.f32.mrb[22].mxu1  ;;  %1429 = vmatprep.mubr.bf16.mxu0 %v1055_v30  ;;  %1590 = vmatprep.mubr.bf16.mxu1 %v1057_v31 }
 0x142   : > { %v952_v42 = vmax.f32 %v802_v35, 0.0  ;;  %v613_v43 = vadd.f32 %v612_v40, %v2752_v9  ;;  %v806_v44 = vadd.f32 %v805_v41, %v2754_v10  ;;  %v614_v45 = vpop.f32.mrb[23].mxu0  ;;  %v807_v46 = vpop.f32.mrb[23].mxu1  ;;  %1430 = vmatmul.mubr.bf16.gmra.mrb[80].mxu0 %v1054_v28  ;;  %1591 = vmatmul.mubr.bf16.gmra.mrb[80].mxu1 %v1056_v29  ;;  %v950_v50 = vmax.f32 %v609_v34, 0.0 }
 0x143   : > { %v953_v47 = vmax.f32 %v804_v39, 0.0  ;;  %v615_v48 = vadd.f32 %v614_v45, %v2756_v11  ;;  %v808_v49 = vadd.f32 %v807_v46, %v2758_v12  ;;  %v951_v53 = vmax.f32 %v611_v38, 0.0 }
 0x144   : > { %v954_v51 = vmax.f32 %v613_v43, 0.0  ;;  %v956_v52 = vmax.f32 %v806_v44, 0.0 }
 0x145   : > { %v955_v54 = vmax.f32 %v615_v48, 0.0  ;;  %v957_v55 = vmax.f32 %v808_v49, 0.0 }
 0x146   : > { %v1058_v56 = vpack.c.bf16 %v954_v51, %v950_v50  ;;  %v1060_v57 = vpack.c.bf16 %v956_v52, %v952_v42 }
 0x147   : > { %v1059_v58 = vpack.c.bf16 %v955_v54, %v951_v53  ;;  %v1061_v59 = vpack.c.bf16 %v957_v55, %v953_v47  ;;  %v618_v60 = vpop.f32.mrb[24].mxu0  ;;  %v811_v61 = vpop.f32.mrb[24].mxu1 }
 0x148   : > { %v619_v62 = vadd.f32 %v618_v60, %v2752_v9  ;;  %v812_v63 = vadd.f32 %v811_v61, %v2754_v10  ;;  %v620_v1 = vpop.f32.mrb[25].mxu0  ;;  %v813_v2 = vpop.f32.mrb[25].mxu1 }
 0x149   : > { %v621_v3 = vadd.f32 %v620_v1, %v2756_v11  ;;  %v814_v4 = vadd.f32 %v813_v2, %v2758_v12  ;;  %v622_v5 = vpop.f32.mrb[26].mxu0  ;;  %v815_v6 = vpop.f32.mrb[26].mxu1  ;;  %1437 = vmatprep.mubr.bf16.mxu0 %v1059_v58  ;;  %1598 = vmatprep.mubr.bf16.mxu1 %v1061_v59 }
 0x14a   : > { %v960_v7 = vmax.f32 %v812_v63, 0.0  ;;  %v623_v8 = vadd.f32 %v622_v5, %v2752_v9  ;;  %v816_v0 = vadd.f32 %v815_v6, %v2754_v10  ;;  %v624_v13 = vpop.f32.mrb[27].mxu0  ;;  %v817_v14 = vpop.f32.mrb[27].mxu1  ;;  %1438 = vmatmul.mubr.bf16.gmra.mrb[84].mxu0 %v1058_v56  ;;  %1599 = vmatmul.mubr.bf16.gmra.mrb[84].mxu1 %v1060_v57  ;;  %v958_v18 = vmax.f32 %v619_v62, 0.0 }
 0x14b   : > { %v961_v15 = vmax.f32 %v814_v4, 0.0  ;;  %v625_v16 = vadd.f32 %v624_v13, %v2756_v11  ;;  %v818_v17 = vadd.f32 %v817_v14, %v2758_v12  ;;  %v959_v21 = vmax.f32 %v621_v3, 0.0 }
 0x14c   : > { %v962_v19 = vmax.f32 %v623_v8, 0.0  ;;  %v964_v20 = vmax.f32 %v816_v0, 0.0 }
 0x14d   : > { %v963_v22 = vmax.f32 %v625_v16, 0.0  ;;  %v965_v23 = vmax.f32 %v818_v17, 0.0 }
 0x14e   : > { %v1062_v24 = vpack.c.bf16 %v962_v19, %v958_v18  ;;  %v1064_v25 = vpack.c.bf16 %v964_v20, %v960_v7 }
 0x14f   : > { %v1063_v26 = vpack.c.bf16 %v963_v22, %v959_v21  ;;  %v1065_v27 = vpack.c.bf16 %v965_v23, %v961_v15  ;;  %v628_v28 = vpop.f32.mrb[28].mxu0  ;;  %v821_v29 = vpop.f32.mrb[28].mxu1 }
 0x150   : > { %v629_v30 = vadd.f32 %v628_v28, %v2752_v9  ;;  %v822_v31 = vadd.f32 %v821_v29, %v2754_v10  ;;  %v630_v32 = vpop.f32.mrb[29].mxu0  ;;  %v823_v33 = vpop.f32.mrb[29].mxu1 }
 0x151   : > { %v631_v34 = vadd.f32 %v630_v32, %v2756_v11  ;;  %v824_v35 = vadd.f32 %v823_v33, %v2758_v12  ;;  %v632_v36 = vpop.f32.mrb[30].mxu0  ;;  %v825_v37 = vpop.f32.mrb[30].mxu1  ;;  %1445 = vmatprep.mubr.bf16.mxu0 %v1063_v26  ;;  %1606 = vmatprep.mubr.bf16.mxu1 %v1065_v27 }
 0x152   : > { %v968_v38 = vmax.f32 %v822_v31, 0.0  ;;  %v633_v39 = vadd.f32 %v632_v36, %v2752_v9  ;;  %v826_v40 = vadd.f32 %v825_v37, %v2754_v10  ;;  %v634_v41 = vpop.f32.mrb[31].mxu0  ;;  %v827_v42 = vpop.f32.mrb[31].mxu1  ;;  %1446 = vmatmul.mubr.bf16.gmra.mrb[88].mxu0 %v1062_v24  ;;  %1607 = vmatmul.mubr.bf16.gmra.mrb[88].mxu1 %v1064_v25  ;;  %v966_v46 = vmax.f32 %v629_v30, 0.0 }
 0x153   : > { %v969_v43 = vmax.f32 %v824_v35, 0.0  ;;  %v635_v44 = vadd.f32 %v634_v41, %v2756_v11  ;;  %v828_v45 = vadd.f32 %v827_v42, %v2758_v12  ;;  %v967_v49 = vmax.f32 %v631_v34, 0.0 }
 0x154   : > { %v970_v47 = vmax.f32 %v633_v39, 0.0  ;;  %v972_v48 = vmax.f32 %v826_v40, 0.0 }
 0x155   : > { %v971_v50 = vmax.f32 %v635_v44, 0.0  ;;  %v973_v51 = vmax.f32 %v828_v45, 0.0 }
 0x156   : > { %v1066_v52 = vpack.c.bf16 %v970_v47, %v966_v46  ;;  %v1068_v53 = vpack.c.bf16 %v972_v48, %v968_v38 }
 0x157   : > { %v1067_v54 = vpack.c.bf16 %v971_v50, %v967_v49  ;;  %v1069_v55 = vpack.c.bf16 %v973_v51, %v969_v43  ;;  %v638_v56 = vpop.f32.mrb[32].mxu0  ;;  %v831_v57 = vpop.f32.mrb[32].mxu1 }
 0x158   : > { %v639_v58 = vadd.f32 %v638_v56, %v2752_v9  ;;  %v832_v59 = vadd.f32 %v831_v57, %v2754_v10  ;;  %v640_v60 = vpop.f32.mrb[33].mxu0  ;;  %v833_v61 = vpop.f32.mrb[33].mxu1 }
 0x159   : > { %v641_v62 = vadd.f32 %v640_v60, %v2756_v11  ;;  %v834_v63 = vadd.f32 %v833_v61, %v2758_v12  ;;  %v642_v1 = vpop.f32.mrb[34].mxu0  ;;  %v835_v2 = vpop.f32.mrb[34].mxu1  ;;  %1453 = vmatprep.mubr.bf16.mxu0 %v1067_v54  ;;  %1614 = vmatprep.mubr.bf16.mxu1 %v1069_v55 }
 0x15a   : > { %v976_v3 = vmax.f32 %v832_v59, 0.0  ;;  %v643_v4 = vadd.f32 %v642_v1, %v2752_v9  ;;  %v836_v5 = vadd.f32 %v835_v2, %v2754_v10  ;;  %v644_v6 = vpop.f32.mrb[35].mxu0  ;;  %v837_v7 = vpop.f32.mrb[35].mxu1  ;;  %1454 = vmatmul.mubr.bf16.gmra.mrb[92].mxu0 %v1066_v52  ;;  %1615 = vmatmul.mubr.bf16.gmra.mrb[92].mxu1 %v1068_v53  ;;  %v974_v14 = vmax.f32 %v639_v58, 0.0 }
 0x15b   : > { %v977_v8 = vmax.f32 %v834_v63, 0.0  ;;  %v645_v0 = vadd.f32 %v644_v6, %v2756_v11  ;;  %v838_v13 = vadd.f32 %v837_v7, %v2758_v12  ;;  %v975_v17 = vmax.f32 %v641_v62, 0.0 }
 0x15c   : > { %v978_v15 = vmax.f32 %v643_v4, 0.0  ;;  %v980_v16 = vmax.f32 %v836_v5, 0.0 }
 0x15d   : > { %v979_v18 = vmax.f32 %v645_v0, 0.0  ;;  %v981_v19 = vmax.f32 %v838_v13, 0.0 }
 0x15e   : > { %v1070_v20 = vpack.c.bf16 %v978_v15, %v974_v14  ;;  %v1072_v21 = vpack.c.bf16 %v980_v16, %v976_v3 }
 0x15f   : > { %v1071_v22 = vpack.c.bf16 %v979_v18, %v975_v17  ;;  %v1073_v23 = vpack.c.bf16 %v981_v19, %v977_v8  ;;  %v648_v24 = vpop.f32.mrb[36].mxu0  ;;  %v841_v25 = vpop.f32.mrb[36].mxu1 }
 0x160   : > { %v649_v26 = vadd.f32 %v648_v24, %v2752_v9  ;;  %v842_v27 = vadd.f32 %v841_v25, %v2754_v10  ;;  %v650_v28 = vpop.f32.mrb[37].mxu0  ;;  %v843_v29 = vpop.f32.mrb[37].mxu1 }
 0x161   : > { %v651_v30 = vadd.f32 %v650_v28, %v2756_v11  ;;  %v844_v31 = vadd.f32 %v843_v29, %v2758_v12  ;;  %v652_v32 = vpop.f32.mrb[38].mxu0  ;;  %v845_v33 = vpop.f32.mrb[38].mxu1  ;;  %1461 = vmatprep.mubr.bf16.mxu0 %v1071_v22  ;;  %1622 = vmatprep.mubr.bf16.mxu1 %v1073_v23 }
 0x162   : > { %v984_v34 = vmax.f32 %v842_v27, 0.0  ;;  %v653_v35 = vadd.f32 %v652_v32, %v2752_v9  ;;  %v846_v36 = vadd.f32 %v845_v33, %v2754_v10  ;;  %v654_v37 = vpop.f32.mrb[39].mxu0  ;;  %v847_v38 = vpop.f32.mrb[39].mxu1  ;;  %1462 = vmatmul.mubr.bf16.gmra.mrb[96].mxu0 %v1070_v20  ;;  %1623 = vmatmul.mubr.bf16.gmra.mrb[96].mxu1 %v1072_v21  ;;  %v982_v42 = vmax.f32 %v649_v26, 0.0 }
 0x163   : > { %v985_v39 = vmax.f32 %v844_v31, 0.0  ;;  %v655_v40 = vadd.f32 %v654_v37, %v2756_v11  ;;  %v848_v41 = vadd.f32 %v847_v38, %v2758_v12  ;;  %v983_v45 = vmax.f32 %v651_v30, 0.0 }
 0x164   : > { %v986_v43 = vmax.f32 %v653_v35, 0.0  ;;  %v988_v44 = vmax.f32 %v846_v36, 0.0 }
 0x165   : > { %v987_v46 = vmax.f32 %v655_v40, 0.0  ;;  %v989_v47 = vmax.f32 %v848_v41, 0.0 }
 0x166   : > { %v1074_v48 = vpack.c.bf16 %v986_v43, %v982_v42  ;;  %v1076_v49 = vpack.c.bf16 %v988_v44, %v984_v34 }
 0x167   : > { %v1075_v50 = vpack.c.bf16 %v987_v46, %v983_v45  ;;  %v1077_v51 = vpack.c.bf16 %v989_v47, %v985_v39  ;;  %v658_v52 = vpop.f32.mrb[40].mxu0  ;;  %v851_v53 = vpop.f32.mrb[40].mxu1 }
 0x168   : > { %v659_v54 = vadd.f32 %v658_v52, %v2752_v9  ;;  %v852_v55 = vadd.f32 %v851_v53, %v2754_v10  ;;  %v660_v56 = vpop.f32.mrb[41].mxu0  ;;  %v853_v57 = vpop.f32.mrb[41].mxu1 }
 0x169   : > { %v661_v58 = vadd.f32 %v660_v56, %v2756_v11  ;;  %v854_v59 = vadd.f32 %v853_v57, %v2758_v12  ;;  %v662_v60 = vpop.f32.mrb[42].mxu0  ;;  %v855_v61 = vpop.f32.mrb[42].mxu1  ;;  %1469 = vmatprep.mubr.bf16.mxu0 %v1075_v50  ;;  %1630 = vmatprep.mubr.bf16.mxu1 %v1077_v51 }
 0x16a   : > { %v992_v62 = vmax.f32 %v852_v55, 0.0  ;;  %v663_v63 = vadd.f32 %v662_v60, %v2752_v9  ;;  %v856_v1 = vadd.f32 %v855_v61, %v2754_v10  ;;  %v664_v2 = vpop.f32.mrb[43].mxu0  ;;  %v857_v3 = vpop.f32.mrb[43].mxu1  ;;  %1470 = vmatmul.mubr.bf16.gmra.mrb[100].mxu0 %v1074_v48  ;;  %1631 = vmatmul.mubr.bf16.gmra.mrb[100].mxu1 %v1076_v49  ;;  %v990_v7 = vmax.f32 %v659_v54, 0.0 }
 0x16b   : > { %v993_v4 = vmax.f32 %v854_v59, 0.0  ;;  %v665_v5 = vadd.f32 %v664_v2, %v2756_v11  ;;  %v858_v6 = vadd.f32 %v857_v3, %v2758_v12  ;;  %v991_v13 = vmax.f32 %v661_v58, 0.0 }
 0x16c   : > { %v994_v8 = vmax.f32 %v663_v63, 0.0  ;;  %v996_v0 = vmax.f32 %v856_v1, 0.0 }
 0x16d   : > { %v995_v14 = vmax.f32 %v665_v5, 0.0  ;;  %v997_v15 = vmax.f32 %v858_v6, 0.0 }
 0x16e   : > { %v1078_v16 = vpack.c.bf16 %v994_v8, %v990_v7  ;;  %v1080_v17 = vpack.c.bf16 %v996_v0, %v992_v62 }
 0x16f   : > { %v1079_v18 = vpack.c.bf16 %v995_v14, %v991_v13  ;;  %v1081_v19 = vpack.c.bf16 %v997_v15, %v993_v4  ;;  %v668_v20 = vpop.f32.mrb[44].mxu0  ;;  %v861_v21 = vpop.f32.mrb[44].mxu1 }
 0x170   : > { %v669_v22 = vadd.f32 %v668_v20, %v2752_v9  ;;  %v862_v23 = vadd.f32 %v861_v21, %v2754_v10  ;;  %v670_v24 = vpop.f32.mrb[45].mxu0  ;;  %v863_v25 = vpop.f32.mrb[45].mxu1 }
 0x171   : > { %v671_v26 = vadd.f32 %v670_v24, %v2756_v11  ;;  %v864_v27 = vadd.f32 %v863_v25, %v2758_v12  ;;  %v672_v28 = vpop.f32.mrb[46].mxu0  ;;  %v865_v29 = vpop.f32.mrb[46].mxu1  ;;  %1477 = vmatprep.mubr.bf16.mxu0 %v1079_v18  ;;  %1638 = vmatprep.mubr.bf16.mxu1 %v1081_v19 }
 0x172   : > { %v1000_v30 = vmax.f32 %v862_v23, 0.0  ;;  %v673_v31 = vadd.f32 %v672_v28, %v2752_v9  ;;  %v866_v32 = vadd.f32 %v865_v29, %v2754_v10  ;;  %v674_v33 = vpop.f32.mrb[47].mxu0  ;;  %v867_v34 = vpop.f32.mrb[47].mxu1  ;;  %1478 = vmatmul.mubr.bf16.gmra.mrb[104].mxu0 %v1078_v16  ;;  %1639 = vmatmul.mubr.bf16.gmra.mrb[104].mxu1 %v1080_v17  ;;  %v998_v38 = vmax.f32 %v669_v22, 0.0 }
 0x173   : > { %v1001_v35 = vmax.f32 %v864_v27, 0.0  ;;  %v675_v36 = vadd.f32 %v674_v33, %v2756_v11  ;;  %v868_v37 = vadd.f32 %v867_v34, %v2758_v12  ;;  %v999_v41 = vmax.f32 %v671_v26, 0.0 }
 0x174   : > { %v1002_v39 = vmax.f32 %v673_v31, 0.0  ;;  %v1004_v40 = vmax.f32 %v866_v32, 0.0 }
 0x175   : > { %v1003_v42 = vmax.f32 %v675_v36, 0.0  ;;  %v1005_v43 = vmax.f32 %v868_v37, 0.0 }
 0x176   : > { %v1082_v44 = vpack.c.bf16 %v1002_v39, %v998_v38  ;;  %v1084_v45 = vpack.c.bf16 %v1004_v40, %v1000_v30 }
 0x177   : > { %v1083_v46 = vpack.c.bf16 %v1003_v42, %v999_v41  ;;  %v1085_v47 = vpack.c.bf16 %v1005_v43, %v1001_v35  ;;  %v678_v48 = vpop.f32.mrb[48].mxu0  ;;  %v871_v49 = vpop.f32.mrb[48].mxu1 }
 0x178   : > { %v679_v50 = vadd.f32 %v678_v48, %v2752_v9  ;;  %v872_v51 = vadd.f32 %v871_v49, %v2754_v10  ;;  %v680_v52 = vpop.f32.mrb[49].mxu0  ;;  %v873_v53 = vpop.f32.mrb[49].mxu1 }
 0x179   : > { %v681_v54 = vadd.f32 %v680_v52, %v2756_v11  ;;  %v874_v55 = vadd.f32 %v873_v53, %v2758_v12  ;;  %v682_v56 = vpop.f32.mrb[50].mxu0  ;;  %v875_v57 = vpop.f32.mrb[50].mxu1  ;;  %1485 = vmatprep.mubr.bf16.mxu0 %v1083_v46  ;;  %1646 = vmatprep.mubr.bf16.mxu1 %v1085_v47 }
 0x17a   : > { %v1008_v58 = vmax.f32 %v872_v51, 0.0  ;;  %v683_v59 = vadd.f32 %v682_v56, %v2752_v9  ;;  %v876_v60 = vadd.f32 %v875_v57, %v2754_v10  ;;  %v684_v61 = vpop.f32.mrb[51].mxu0  ;;  %v877_v62 = vpop.f32.mrb[51].mxu1  ;;  %1486 = vmatmul.mubr.bf16.gmra.mrb[108].mxu0 %v1082_v44  ;;  %1647 = vmatmul.mubr.bf16.gmra.mrb[108].mxu1 %v1084_v45  ;;  %v1006_v3 = vmax.f32 %v679_v50, 0.0 }
 0x17b   : > { %v1009_v63 = vmax.f32 %v874_v55, 0.0  ;;  %v685_v1 = vadd.f32 %v684_v61, %v2756_v11  ;;  %v878_v2 = vadd.f32 %v877_v62, %v2758_v12  ;;  %v1007_v6 = vmax.f32 %v681_v54, 0.0 }
 0x17c   : > { %v1010_v4 = vmax.f32 %v683_v59, 0.0  ;;  %v1012_v5 = vmax.f32 %v876_v60, 0.0 }
 0x17d   : > { %v1011_v7 = vmax.f32 %v685_v1, 0.0  ;;  %v1013_v8 = vmax.f32 %v878_v2, 0.0 }
 0x17e   : > { %v1086_v0 = vpack.c.bf16 %v1010_v4, %v1006_v3  ;;  %v1088_v13 = vpack.c.bf16 %v1012_v5, %v1008_v58 }
 0x17f   : > { %v1087_v14 = vpack.c.bf16 %v1011_v7, %v1007_v6  ;;  %v1089_v15 = vpack.c.bf16 %v1013_v8, %v1009_v63  ;;  %v688_v16 = vpop.f32.mrb[52].mxu0  ;;  %v881_v17 = vpop.f32.mrb[52].mxu1 }
 0x180   : > { %v689_v18 = vadd.f32 %v688_v16, %v2752_v9  ;;  %v882_v19 = vadd.f32 %v881_v17, %v2754_v10  ;;  %v690_v20 = vpop.f32.mrb[53].mxu0  ;;  %v883_v21 = vpop.f32.mrb[53].mxu1 }
 0x181   : > { %v691_v22 = vadd.f32 %v690_v20, %v2756_v11  ;;  %v884_v23 = vadd.f32 %v883_v21, %v2758_v12  ;;  %v692_v24 = vpop.f32.mrb[54].mxu0  ;;  %v885_v25 = vpop.f32.mrb[54].mxu1  ;;  %1493 = vmatprep.mubr.bf16.mxu0 %v1087_v14  ;;  %1654 = vmatprep.mubr.bf16.mxu1 %v1089_v15 }
 0x182   : > { %v1016_v26 = vmax.f32 %v882_v19, 0.0  ;;  %v693_v27 = vadd.f32 %v692_v24, %v2752_v9  ;;  %v886_v28 = vadd.f32 %v885_v25, %v2754_v10  ;;  %v694_v29 = vpop.f32.mrb[55].mxu0  ;;  %v887_v30 = vpop.f32.mrb[55].mxu1  ;;  %1494 = vmatmul.mubr.bf16.gmra.mrb[112].mxu0 %v1086_v0  ;;  %1655 = vmatmul.mubr.bf16.gmra.mrb[112].mxu1 %v1088_v13  ;;  %v1014_v34 = vmax.f32 %v689_v18, 0.0 }
 0x183   : > { %v1017_v31 = vmax.f32 %v884_v23, 0.0  ;;  %v695_v32 = vadd.f32 %v694_v29, %v2756_v11  ;;  %v888_v33 = vadd.f32 %v887_v30, %v2758_v12  ;;  %v1015_v37 = vmax.f32 %v691_v22, 0.0 }
 0x184   : > { %v1018_v35 = vmax.f32 %v693_v27, 0.0  ;;  %v1020_v36 = vmax.f32 %v886_v28, 0.0 }
 0x185   : > { %v1019_v38 = vmax.f32 %v695_v32, 0.0  ;;  %v1021_v39 = vmax.f32 %v888_v33, 0.0 }
 0x186   : > { %v1090_v40 = vpack.c.bf16 %v1018_v35, %v1014_v34  ;;  %v1092_v41 = vpack.c.bf16 %v1020_v36, %v1016_v26 }
 0x187   : > { %v1091_v42 = vpack.c.bf16 %v1019_v38, %v1015_v37  ;;  %v1093_v43 = vpack.c.bf16 %v1021_v39, %v1017_v31  ;;  %v698_v44 = vpop.f32.mrb[56].mxu0  ;;  %v891_v45 = vpop.f32.mrb[56].mxu1 }
 0x188   : > { %v699_v46 = vadd.f32 %v698_v44, %v2752_v9  ;;  %v892_v47 = vadd.f32 %v891_v45, %v2754_v10  ;;  %v700_v48 = vpop.f32.mrb[57].mxu0  ;;  %v893_v49 = vpop.f32.mrb[57].mxu1 }
 0x189   : > { %v701_v50 = vadd.f32 %v700_v48, %v2756_v11  ;;  %v894_v51 = vadd.f32 %v893_v49, %v2758_v12  ;;  %v702_v52 = vpop.f32.mrb[58].mxu0  ;;  %v895_v53 = vpop.f32.mrb[58].mxu1  ;;  %1501 = vmatprep.mubr.bf16.mxu0 %v1091_v42  ;;  %1662 = vmatprep.mubr.bf16.mxu1 %v1093_v43 }
 0x18a   : > { %v1024_v54 = vmax.f32 %v892_v47, 0.0  ;;  %v703_v55 = vadd.f32 %v702_v52, %v2752_v9  ;;  %v896_v56 = vadd.f32 %v895_v53, %v2754_v10  ;;  %v704_v57 = vpop.f32.mrb[59].mxu0  ;;  %v897_v58 = vpop.f32.mrb[59].mxu1  ;;  %1502 = vmatmul.mubr.bf16.gmra.mrb[116].mxu0 %v1090_v40  ;;  %1663 = vmatmul.mubr.bf16.gmra.mrb[116].mxu1 %v1092_v41  ;;  %v1022_v62 = vmax.f32 %v699_v46, 0.0 }
 0x18b   : > { %v1025_v59 = vmax.f32 %v894_v51, 0.0  ;;  %v705_v60 = vadd.f32 %v704_v57, %v2756_v11  ;;  %v898_v61 = vadd.f32 %v897_v58, %v2758_v12  ;;  %v1023_v2 = vmax.f32 %v701_v50, 0.0 }
 0x18c   : > { %v1026_v63 = vmax.f32 %v703_v55, 0.0  ;;  %v1028_v1 = vmax.f32 %v896_v56, 0.0 }
 0x18d   : > { %v1027_v3 = vmax.f32 %v705_v60, 0.0  ;;  %v1029_v4 = vmax.f32 %v898_v61, 0.0 }
 0x18e   : > { %v1094_v5 = vpack.c.bf16 %v1026_v63, %v1022_v62  ;;  %v1096_v6 = vpack.c.bf16 %v1028_v1, %v1024_v54 }
 0x18f   : > { %v1095_v7 = vpack.c.bf16 %v1027_v3, %v1023_v2  ;;  %v1097_v8 = vpack.c.bf16 %v1029_v4, %v1025_v59  ;;  %v708_v0 = vpop.f32.mrb[60].mxu0  ;;  %v901_v13 = vpop.f32.mrb[60].mxu1 }
 0x190   : > { %v709_v14 = vadd.f32 %v708_v0, %v2752_v9  ;;  %v902_v15 = vadd.f32 %v901_v13, %v2754_v10  ;;  %v710_v16 = vpop.f32.mrb[61].mxu0  ;;  %v903_v17 = vpop.f32.mrb[61].mxu1 }
 0x191   : > { %v711_v18 = vadd.f32 %v710_v16, %v2756_v11  ;;  %v904_v19 = vadd.f32 %v903_v17, %v2758_v12  ;;  %v712_v20 = vpop.f32.mrb[62].mxu0  ;;  %v905_v21 = vpop.f32.mrb[62].mxu1  ;;  %1509 = vmatprep.mubr.bf16.mxu0 %v1095_v7  ;;  %1670 = vmatprep.mubr.bf16.mxu1 %v1097_v8 }
 0x192   : > { %v1032_v22 = vmax.f32 %v902_v15, 0.0  ;;  %v713_v23 = vadd.f32 %v712_v20, %v2752_v9  ;;  %v906_v24 = vadd.f32 %v905_v21, %v2754_v10  ;;  %v714_v25 = vpop.f32.mrb[63].mxu0  ;;  %v907_v26 = vpop.f32.mrb[63].mxu1  ;;  %1510 = vmatmul.mubr.bf16.gmra.mrb[120].mxu0 %v1094_v5  ;;  %1671 = vmatmul.mubr.bf16.gmra.mrb[120].mxu1 %v1096_v6  ;;  %v1030_v30 = vmax.f32 %v709_v14, 0.0 }
 0x193   : > { %v1033_v27 = vmax.f32 %v904_v19, 0.0  ;;  %v715_v28 = vadd.f32 %v714_v25, %v2756_v11  ;;  %v908_v29 = vadd.f32 %v907_v26, %v2758_v12  ;;  %v1031_v33 = vmax.f32 %v711_v18, 0.0  ;;  %v2892_v12 = vld [vmem:[%s3023_s4] ss:$0 sm:$0xff] }
 0x194   : > { %v1034_v31 = vmax.f32 %v713_v23, 0.0  ;;  %v1036_v32 = vmax.f32 %v906_v24, 0.0 }
 0x195   : > { %v1035_v34 = vmax.f32 %v715_v28, 0.0  ;;  %v1037_v35 = vmax.f32 %v908_v29, 0.0 }
 0x196   : > { %v1098_v9 = vpack.c.bf16 %v1034_v31, %v1030_v30  ;;  %v1100_v36 = vpack.c.bf16 %v1036_v32, %v1032_v22 }
 0x197   : > { %v1099_v10 = vpack.c.bf16 %v1035_v34, %v1031_v33  ;;  %v1101_v37 = vpack.c.bf16 %v1037_v35, %v1033_v27 }
 0x199   : > { %1517 = vmatprep.mubr.bf16.mxu0 %v1099_v10  ;;  %1678 = vmatprep.mubr.bf16.mxu1 %v1101_v37 }
 0x19a   : > { %1518 = vmatmul.mubr.bf16.gmra.mrb[124].mxu0 %v1098_v9  ;;  %1679 = vmatmul.mubr.bf16.gmra.mrb[124].mxu1 %v1100_v36 }
 0x1f5   : > { %v1954_v11 = vpop.f32.mrb[64].mxu0  ;;  %v2066_v38 = vpop.f32.mrb[64].mxu1 }
 0x1f6   : > { %v1955_v39 = vpop.f32.mrb[65].mxu0  ;;  %v2067_v40 = vpop.f32.mrb[65].mxu1 }
 0x1f7   : > { %v1956_v41 = vadd.f32 %v1955_v39, %v1954_v11  ;;  %v2068_v42 = vadd.f32 %v2067_v40, %v2066_v38  ;;  %v1957_v43 = vpop.f32.mrb[66].mxu0  ;;  %v2069_v44 = vpop.f32.mrb[66].mxu1 }
 0x1f8   : > { %v1958_v45 = vpop.f32.mrb[67].mxu0  ;;  %v2070_v46 = vpop.f32.mrb[67].mxu1 }
 0x1f9   : > { %v1400_v47 = vadd.f32 %v1956_v41, %v2892_v12  ;;  %v1959_v48 = vadd.f32 %v1958_v45, %v1957_v43  ;;  %v2071_v49 = vadd.f32 %v2070_v46, %v2069_v44 }
 0x1fb   : > { %v1561_v50 = vadd.f32 %v2068_v42, %v1400_v47  ;;  %v1403_v51 = vadd.f32 %v1959_v48, %v2892_v12 }
 0x1fd   : > { %1687 = vst [vmem:[%s2898_s13] sm:$0xff] %v1561_v50  ;;  %v1564_v52 = vadd.f32 %v2071_v49, %v1403_v51  ;;  %v1960_v53 = vpop.f32.mrb[68].mxu0  ;;  %v2072_v54 = vpop.f32.mrb[68].mxu1 }
 0x1fe   : > { %v1961_v55 = vpop.f32.mrb[69].mxu0  ;;  %v2073_v56 = vpop.f32.mrb[69].mxu1 }
 0x1ff   : > { %1688 = vst [vmem:[%s2898_s13 + $0x8] sm:$0xff] %v1564_v52  ;;  %v1962_v57 = vadd.f32 %v1961_v55, %v1960_v53  ;;  %v2074_v58 = vadd.f32 %v2073_v56, %v2072_v54  ;;  %v1963_v59 = vpop.f32.mrb[70].mxu0  ;;  %v2075_v60 = vpop.f32.mrb[70].mxu1 }
 0x200   : > { %v1964_v61 = vpop.f32.mrb[71].mxu0  ;;  %v2076_v62 = vpop.f32.mrb[71].mxu1 }
 0x201   : > { %v1408_v63 = vadd.f32 %v1962_v57, %v2892_v12  ;;  %v1965_v1 = vadd.f32 %v1964_v61, %v1963_v59  ;;  %v2077_v2 = vadd.f32 %v2076_v62, %v2075_v60 }
 0x203   : > { %v1569_v3 = vadd.f32 %v2074_v58, %v1408_v63  ;;  %v1411_v4 = vadd.f32 %v1965_v1, %v2892_v12 }
 0x205   : > { %1689 = vst [vmem:[%s2898_s13 + $0x10] sm:$0xff] %v1569_v3  ;;  %v1572_v5 = vadd.f32 %v2077_v2, %v1411_v4  ;;  %v1966_v6 = vpop.f32.mrb[72].mxu0  ;;  %v2078_v7 = vpop.f32.mrb[72].mxu1 }
 0x206   : > { %v1967_v8 = vpop.f32.mrb[73].mxu0  ;;  %v2079_v0 = vpop.f32.mrb[73].mxu1 }
 0x207   : > { %1690 = vst [vmem:[%s2898_s13 + $0x18] sm:$0xff] %v1572_v5  ;;  %v1968_v13 = vadd.f32 %v1967_v8, %v1966_v6  ;;  %v2080_v14 = vadd.f32 %v2079_v0, %v2078_v7  ;;  %v1969_v15 = vpop.f32.mrb[74].mxu0  ;;  %v2081_v16 = vpop.f32.mrb[74].mxu1 }
 0x208   : > { %v1970_v17 = vpop.f32.mrb[75].mxu0  ;;  %v2082_v18 = vpop.f32.mrb[75].mxu1 }
 0x209   : > { %v1416_v19 = vadd.f32 %v1968_v13, %v2892_v12  ;;  %v1971_v20 = vadd.f32 %v1970_v17, %v1969_v15  ;;  %v2083_v21 = vadd.f32 %v2082_v18, %v2081_v16 }
 0x20b   : > { %v1577_v22 = vadd.f32 %v2080_v14, %v1416_v19  ;;  %v1419_v23 = vadd.f32 %v1971_v20, %v2892_v12 }
 0x20d   : > { %1691 = vst [vmem:[%s2898_s13 + $0x20] sm:$0xff] %v1577_v22  ;;  %v1580_v24 = vadd.f32 %v2083_v21, %v1419_v23  ;;  %v1972_v25 = vpop.f32.mrb[76].mxu0  ;;  %v2084_v26 = vpop.f32.mrb[76].mxu1 }
 0x20e   : > { %v1973_v27 = vpop.f32.mrb[77].mxu0  ;;  %v2085_v28 = vpop.f32.mrb[77].mxu1 }
 0x20f   : > { %1692 = vst [vmem:[%s2898_s13 + $0x28] sm:$0xff] %v1580_v24  ;;  %v1974_v29 = vadd.f32 %v1973_v27, %v1972_v25  ;;  %v2086_v30 = vadd.f32 %v2085_v28, %v2084_v26  ;;  %v1975_v31 = vpop.f32.mrb[78].mxu0  ;;  %v2087_v32 = vpop.f32.mrb[78].mxu1 }
 0x210   : > { %v1976_v33 = vpop.f32.mrb[79].mxu0  ;;  %v2088_v34 = vpop.f32.mrb[79].mxu1 }
 0x211   : > { %v1424_v35 = vadd.f32 %v1974_v29, %v2892_v12  ;;  %v1977_v9 = vadd.f32 %v1976_v33, %v1975_v31  ;;  %v2089_v36 = vadd.f32 %v2088_v34, %v2087_v32 }
 0x213   : > { %v1585_v10 = vadd.f32 %v2086_v30, %v1424_v35  ;;  %v1427_v37 = vadd.f32 %v1977_v9, %v2892_v12 }
 0x215   : > { %1693 = vst [vmem:[%s2898_s13 + $0x30] sm:$0xff] %v1585_v10  ;;  %v1588_v11 = vadd.f32 %v2089_v36, %v1427_v37  ;;  %v1978_v38 = vpop.f32.mrb[80].mxu0  ;;  %v2090_v39 = vpop.f32.mrb[80].mxu1 }
 0x216   : > { %v1979_v40 = vpop.f32.mrb[81].mxu0  ;;  %v2091_v41 = vpop.f32.mrb[81].mxu1 }
 0x217   : > { %1694 = vst [vmem:[%s2898_s13 + $0x38] sm:$0xff] %v1588_v11  ;;  %v1980_v42 = vadd.f32 %v1979_v40, %v1978_v38  ;;  %v2092_v43 = vadd.f32 %v2091_v41, %v2090_v39  ;;  %v1981_v44 = vpop.f32.mrb[82].mxu0  ;;  %v2093_v45 = vpop.f32.mrb[82].mxu1 }
 0x218   : > { %v1982_v46 = vpop.f32.mrb[83].mxu0  ;;  %v2094_v47 = vpop.f32.mrb[83].mxu1 }
 0x219   : > { %v1432_v48 = vadd.f32 %v1980_v42, %v2892_v12  ;;  %v1983_v49 = vadd.f32 %v1982_v46, %v1981_v44  ;;  %v2095_v50 = vadd.f32 %v2094_v47, %v2093_v45 }
 0x21b   : > { %v1593_v51 = vadd.f32 %v2092_v43, %v1432_v48  ;;  %v1435_v52 = vadd.f32 %v1983_v49, %v2892_v12 }
 0x21d   : > { %1695 = vst [vmem:[%s2898_s13 + $0x40] sm:$0xff] %v1593_v51  ;;  %v1596_v53 = vadd.f32 %v2095_v50, %v1435_v52  ;;  %v1984_v54 = vpop.f32.mrb[84].mxu0  ;;  %v2096_v55 = vpop.f32.mrb[84].mxu1 }
 0x21e   : > { %v1985_v56 = vpop.f32.mrb[85].mxu0  ;;  %v2097_v57 = vpop.f32.mrb[85].mxu1 }
 0x21f   : > { %1696 = vst [vmem:[%s2898_s13 + $0x48] sm:$0xff] %v1596_v53  ;;  %v1986_v58 = vadd.f32 %v1985_v56, %v1984_v54  ;;  %v2098_v59 = vadd.f32 %v2097_v57, %v2096_v55  ;;  %v1987_v60 = vpop.f32.mrb[86].mxu0  ;;  %v2099_v61 = vpop.f32.mrb[86].mxu1 }
 0x220   : > { %v1988_v62 = vpop.f32.mrb[87].mxu0  ;;  %v2100_v63 = vpop.f32.mrb[87].mxu1 }
 0x221   : > { %v1440_v1 = vadd.f32 %v1986_v58, %v2892_v12  ;;  %v1989_v2 = vadd.f32 %v1988_v62, %v1987_v60  ;;  %v2101_v3 = vadd.f32 %v2100_v63, %v2099_v61 }
 0x223   : > { %v1601_v4 = vadd.f32 %v2098_v59, %v1440_v1  ;;  %v1443_v5 = vadd.f32 %v1989_v2, %v2892_v12 }
 0x225   : > { %1697 = vst [vmem:[%s2898_s13 + $0x50] sm:$0xff] %v1601_v4  ;;  %v1604_v6 = vadd.f32 %v2101_v3, %v1443_v5  ;;  %v1990_v7 = vpop.f32.mrb[88].mxu0  ;;  %v2102_v8 = vpop.f32.mrb[88].mxu1 }
 0x226   : > { %v1991_v0 = vpop.f32.mrb[89].mxu0  ;;  %v2103_v13 = vpop.f32.mrb[89].mxu1 }
 0x227   : > { %1698 = vst [vmem:[%s2898_s13 + $0x58] sm:$0xff] %v1604_v6  ;;  %v1992_v14 = vadd.f32 %v1991_v0, %v1990_v7  ;;  %v2104_v15 = vadd.f32 %v2103_v13, %v2102_v8  ;;  %v1993_v16 = vpop.f32.mrb[90].mxu0  ;;  %v2105_v17 = vpop.f32.mrb[90].mxu1 }
 0x228   : > { %v1994_v18 = vpop.f32.mrb[91].mxu0  ;;  %v2106_v19 = vpop.f32.mrb[91].mxu1 }
 0x229   : > { %v1448_v20 = vadd.f32 %v1992_v14, %v2892_v12  ;;  %v1995_v21 = vadd.f32 %v1994_v18, %v1993_v16  ;;  %v2107_v22 = vadd.f32 %v2106_v19, %v2105_v17 }
 0x22b   : > { %v1609_v23 = vadd.f32 %v2104_v15, %v1448_v20  ;;  %v1451_v24 = vadd.f32 %v1995_v21, %v2892_v12 }
 0x22d   : > { %1699 = vst [vmem:[%s2898_s13 + $0x60] sm:$0xff] %v1609_v23  ;;  %v1612_v25 = vadd.f32 %v2107_v22, %v1451_v24  ;;  %v1996_v26 = vpop.f32.mrb[92].mxu0  ;;  %v2108_v27 = vpop.f32.mrb[92].mxu1 }
 0x22e   : > { %v1997_v28 = vpop.f32.mrb[93].mxu0  ;;  %v2109_v29 = vpop.f32.mrb[93].mxu1 }
 0x22f   : > { %1700 = vst [vmem:[%s2898_s13 + $0x68] sm:$0xff] %v1612_v25  ;;  %v1998_v30 = vadd.f32 %v1997_v28, %v1996_v26  ;;  %v2110_v31 = vadd.f32 %v2109_v29, %v2108_v27  ;;  %v1999_v32 = vpop.f32.mrb[94].mxu0  ;;  %v2111_v33 = vpop.f32.mrb[94].mxu1 }
 0x230   : > { %v2000_v34 = vpop.f32.mrb[95].mxu0  ;;  %v2112_v35 = vpop.f32.mrb[95].mxu1 }
 0x231   : > { %v1456_v9 = vadd.f32 %v1998_v30, %v2892_v12  ;;  %v2001_v36 = vadd.f32 %v2000_v34, %v1999_v32  ;;  %v2113_v10 = vadd.f32 %v2112_v35, %v2111_v33 }
 0x233   : > { %v1617_v37 = vadd.f32 %v2110_v31, %v1456_v9  ;;  %v1459_v11 = vadd.f32 %v2001_v36, %v2892_v12 }
 0x235   : > { %1701 = vst [vmem:[%s2898_s13 + $0x70] sm:$0xff] %v1617_v37  ;;  %v1620_v38 = vadd.f32 %v2113_v10, %v1459_v11  ;;  %v2002_v39 = vpop.f32.mrb[96].mxu0  ;;  %v2114_v40 = vpop.f32.mrb[96].mxu1 }
 0x236   : > { %v2003_v41 = vpop.f32.mrb[97].mxu0  ;;  %v2115_v42 = vpop.f32.mrb[97].mxu1 }
 0x237   : > { %1702 = vst [vmem:[%s2898_s13 + $0x78] sm:$0xff] %v1620_v38  ;;  %v2004_v43 = vadd.f32 %v2003_v41, %v2002_v39  ;;  %v2116_v44 = vadd.f32 %v2115_v42, %v2114_v40  ;;  %v2005_v45 = vpop.f32.mrb[98].mxu0  ;;  %v2117_v46 = vpop.f32.mrb[98].mxu1 }
 0x238   : > { %v2006_v47 = vpop.f32.mrb[99].mxu0  ;;  %v2118_v48 = vpop.f32.mrb[99].mxu1 }
 0x239   : > { %v1464_v49 = vadd.f32 %v2004_v43, %v2892_v12  ;;  %v2007_v50 = vadd.f32 %v2006_v47, %v2005_v45  ;;  %v2119_v51 = vadd.f32 %v2118_v48, %v2117_v46 }
 0x23b   : > { %v1625_v52 = vadd.f32 %v2116_v44, %v1464_v49  ;;  %v1467_v53 = vadd.f32 %v2007_v50, %v2892_v12 }
 0x23d   : > { %1703 = vst [vmem:[%s2898_s13 + $0x80] sm:$0xff] %v1625_v52  ;;  %v1628_v54 = vadd.f32 %v2119_v51, %v1467_v53  ;;  %v2008_v55 = vpop.f32.mrb[100].mxu0  ;;  %v2120_v56 = vpop.f32.mrb[100].mxu1 }
 0x23e   : > { %v2009_v57 = vpop.f32.mrb[101].mxu0  ;;  %v2121_v58 = vpop.f32.mrb[101].mxu1 }
 0x23f   : > { %1704 = vst [vmem:[%s2898_s13 + $0x88] sm:$0xff] %v1628_v54  ;;  %v2010_v59 = vadd.f32 %v2009_v57, %v2008_v55  ;;  %v2122_v60 = vadd.f32 %v2121_v58, %v2120_v56  ;;  %v2011_v61 = vpop.f32.mrb[102].mxu0  ;;  %v2123_v62 = vpop.f32.mrb[102].mxu1 }
 0x240   : > { %v2012_v63 = vpop.f32.mrb[103].mxu0  ;;  %v2124_v1 = vpop.f32.mrb[103].mxu1 }
 0x241   : > { %v1472_v2 = vadd.f32 %v2010_v59, %v2892_v12  ;;  %v2013_v3 = vadd.f32 %v2012_v63, %v2011_v61  ;;  %v2125_v4 = vadd.f32 %v2124_v1, %v2123_v62 }
 0x243   : > { %v1633_v5 = vadd.f32 %v2122_v60, %v1472_v2  ;;  %v1475_v6 = vadd.f32 %v2013_v3, %v2892_v12 }
 0x245   : > { %1705 = vst [vmem:[%s2898_s13 + $0x90] sm:$0xff] %v1633_v5  ;;  %v1636_v7 = vadd.f32 %v2125_v4, %v1475_v6  ;;  %v2014_v8 = vpop.f32.mrb[104].mxu0  ;;  %v2126_v0 = vpop.f32.mrb[104].mxu1 }
 0x246   : > { %v2015_v13 = vpop.f32.mrb[105].mxu0  ;;  %v2127_v14 = vpop.f32.mrb[105].mxu1 }
 0x247   : > { %1706 = vst [vmem:[%s2898_s13 + $0x98] sm:$0xff] %v1636_v7  ;;  %v2016_v15 = vadd.f32 %v2015_v13, %v2014_v8  ;;  %v2128_v16 = vadd.f32 %v2127_v14, %v2126_v0  ;;  %v2017_v17 = vpop.f32.mrb[106].mxu0  ;;  %v2129_v18 = vpop.f32.mrb[106].mxu1 }
 0x248   : > { %v2018_v19 = vpop.f32.mrb[107].mxu0  ;;  %v2130_v20 = vpop.f32.mrb[107].mxu1 }
 0x249   : > { %v1480_v21 = vadd.f32 %v2016_v15, %v2892_v12  ;;  %v2019_v22 = vadd.f32 %v2018_v19, %v2017_v17  ;;  %v2131_v23 = vadd.f32 %v2130_v20, %v2129_v18 }
 0x24b   : > { %v1641_v24 = vadd.f32 %v2128_v16, %v1480_v21  ;;  %v1483_v25 = vadd.f32 %v2019_v22, %v2892_v12 }
 0x24d   : > { %1707 = vst [vmem:[%s2898_s13 + $0xa0] sm:$0xff] %v1641_v24  ;;  %v1644_v26 = vadd.f32 %v2131_v23, %v1483_v25  ;;  %v2020_v27 = vpop.f32.mrb[108].mxu0  ;;  %v2132_v28 = vpop.f32.mrb[108].mxu1 }
 0x24e   : > { %v2021_v29 = vpop.f32.mrb[109].mxu0  ;;  %v2133_v30 = vpop.f32.mrb[109].mxu1 }
 0x24f   : > { %1708 = vst [vmem:[%s2898_s13 + $0xa8] sm:$0xff] %v1644_v26  ;;  %v2022_v31 = vadd.f32 %v2021_v29, %v2020_v27  ;;  %v2134_v32 = vadd.f32 %v2133_v30, %v2132_v28  ;;  %v2023_v33 = vpop.f32.mrb[110].mxu0  ;;  %v2135_v34 = vpop.f32.mrb[110].mxu1 }
 0x250   : > { %v2024_v35 = vpop.f32.mrb[111].mxu0  ;;  %v2136_v9 = vpop.f32.mrb[111].mxu1 }
 0x251   : > { %v1488_v36 = vadd.f32 %v2022_v31, %v2892_v12  ;;  %v2025_v10 = vadd.f32 %v2024_v35, %v2023_v33  ;;  %v2137_v37 = vadd.f32 %v2136_v9, %v2135_v34 }
 0x253   : > { %v1649_v11 = vadd.f32 %v2134_v32, %v1488_v36  ;;  %v1491_v38 = vadd.f32 %v2025_v10, %v2892_v12 }
 0x255   : > { %1709 = vst [vmem:[%s2898_s13 + $0xb0] sm:$0xff] %v1649_v11  ;;  %v1652_v39 = vadd.f32 %v2137_v37, %v1491_v38  ;;  %v2026_v40 = vpop.f32.mrb[112].mxu0  ;;  %v2138_v41 = vpop.f32.mrb[112].mxu1 }
 0x256   : > { %v2027_v42 = vpop.f32.mrb[113].mxu0  ;;  %v2139_v43 = vpop.f32.mrb[113].mxu1 }
 0x257   : > { %1710 = vst [vmem:[%s2898_s13 + $0xb8] sm:$0xff] %v1652_v39  ;;  %v2028_v44 = vadd.f32 %v2027_v42, %v2026_v40  ;;  %v2140_v45 = vadd.f32 %v2139_v43, %v2138_v41  ;;  %v2029_v46 = vpop.f32.mrb[114].mxu0  ;;  %v2141_v47 = vpop.f32.mrb[114].mxu1 }
 0x258   : > { %v2030_v48 = vpop.f32.mrb[115].mxu0  ;;  %v2142_v49 = vpop.f32.mrb[115].mxu1 }
 0x259   : > { %v1496_v50 = vadd.f32 %v2028_v44, %v2892_v12  ;;  %v2031_v51 = vadd.f32 %v2030_v48, %v2029_v46  ;;  %v2143_v52 = vadd.f32 %v2142_v49, %v2141_v47 }
 0x25b   : > { %v1657_v53 = vadd.f32 %v2140_v45, %v1496_v50  ;;  %v1499_v54 = vadd.f32 %v2031_v51, %v2892_v12 }
 0x25d   : > { %1711 = vst [vmem:[%s2898_s13 + $0xc0] sm:$0xff] %v1657_v53  ;;  %v1660_v55 = vadd.f32 %v2143_v52, %v1499_v54  ;;  %v2032_v56 = vpop.f32.mrb[116].mxu0  ;;  %v2144_v57 = vpop.f32.mrb[116].mxu1 }
 0x25e   : > { %v2033_v58 = vpop.f32.mrb[117].mxu0  ;;  %v2145_v59 = vpop.f32.mrb[117].mxu1 }
 0x25f   : > { %1712 = vst [vmem:[%s2898_s13 + $0xc8] sm:$0xff] %v1660_v55  ;;  %v2034_v60 = vadd.f32 %v2033_v58, %v2032_v56  ;;  %v2146_v61 = vadd.f32 %v2145_v59, %v2144_v57  ;;  %v2035_v62 = vpop.f32.mrb[118].mxu0  ;;  %v2147_v63 = vpop.f32.mrb[118].mxu1 }
 0x260   : > { %v2036_v1 = vpop.f32.mrb[119].mxu0  ;;  %v2148_v2 = vpop.f32.mrb[119].mxu1 }
 0x261   : > { %v1504_v3 = vadd.f32 %v2034_v60, %v2892_v12  ;;  %v2037_v4 = vadd.f32 %v2036_v1, %v2035_v62  ;;  %v2149_v5 = vadd.f32 %v2148_v2, %v2147_v63 }
 0x263   : > { %v1665_v6 = vadd.f32 %v2146_v61, %v1504_v3  ;;  %v1507_v7 = vadd.f32 %v2037_v4, %v2892_v12 }
 0x265   : > { %1713 = vst [vmem:[%s2898_s13 + $0xd0] sm:$0xff] %v1665_v6  ;;  %v1668_v8 = vadd.f32 %v2149_v5, %v1507_v7  ;;  %v2038_v0 = vpop.f32.mrb[120].mxu0  ;;  %v2150_v13 = vpop.f32.mrb[120].mxu1 }
 0x266   : > { %v2039_v14 = vpop.f32.mrb[121].mxu0  ;;  %v2151_v15 = vpop.f32.mrb[121].mxu1 }
 0x267   : > { %1714 = vst [vmem:[%s2898_s13 + $0xd8] sm:$0xff] %v1668_v8  ;;  %v2040_v16 = vadd.f32 %v2039_v14, %v2038_v0  ;;  %v2152_v17 = vadd.f32 %v2151_v15, %v2150_v13  ;;  %v2041_v18 = vpop.f32.mrb[122].mxu0  ;;  %v2153_v19 = vpop.f32.mrb[122].mxu1 }
 0x268   : > { %v2042_v20 = vpop.f32.mrb[123].mxu0  ;;  %v2154_v21 = vpop.f32.mrb[123].mxu1 }
 0x269   : > { %v1512_v22 = vadd.f32 %v2040_v16, %v2892_v12  ;;  %v2043_v23 = vadd.f32 %v2042_v20, %v2041_v18  ;;  %v2155_v24 = vadd.f32 %v2154_v21, %v2153_v19 }
 0x26b   : > { %v1673_v25 = vadd.f32 %v2152_v17, %v1512_v22  ;;  %v1515_v26 = vadd.f32 %v2043_v23, %v2892_v12 }
 0x26d   : > { %1715 = vst [vmem:[%s2898_s13 + $0xe0] sm:$0xff] %v1673_v25  ;;  %v1676_v27 = vadd.f32 %v2155_v24, %v1515_v26  ;;  %v2044_v28 = vpop.f32.mrb[124].mxu0  ;;  %v2156_v29 = vpop.f32.mrb[124].mxu1 }
 0x26e   : > { %v2045_v30 = vpop.f32.mrb[125].mxu0  ;;  %v2157_v31 = vpop.f32.mrb[125].mxu1 }
 0x26f   : > { %1716 = vst [vmem:[%s2898_s13 + $0xe8] sm:$0xff] %v1676_v27  ;;  %v2046_v32 = vadd.f32 %v2045_v30, %v2044_v28  ;;  %v2158_v33 = vadd.f32 %v2157_v31, %v2156_v29  ;;  %v2047_v34 = vpop.f32.mrb[126].mxu0  ;;  %v2159_v35 = vpop.f32.mrb[126].mxu1 }
 0x270   : > { %v2048_v9 = vpop.f32.mrb[127].mxu0  ;;  %v2160_v36 = vpop.f32.mrb[127].mxu1 }
 0x271   : > { %v1520_v10 = vadd.f32 %v2046_v32, %v2892_v12  ;;  %v2049_v37 = vadd.f32 %v2048_v9, %v2047_v34  ;;  %v2161_v11 = vadd.f32 %v2160_v36, %v2159_v35 }
 0x273   : > { %v1681_v38 = vadd.f32 %v2158_v33, %v1520_v10  ;;  %v1523_v39 = vadd.f32 %v2049_v37, %v2892_v12 }
 0x275   : > { %1717 = vst [vmem:[%s2898_s13 + $0xf0] sm:$0xff] %v1681_v38  ;;  %v1684_v40 = vadd.f32 %v2161_v11, %v1523_v39 }
 0x277   : > { %1718 = vst [vmem:[%s2898_s13 + $0xf8] sm:$0xff] %v1684_v40 }
 0x278   : > { %2336 = shalt.err (!%p2333_p6)
}
 0x279   : > { %s2337_s7 = scalar_lea.hbm %s2965_s25, 4096  ;;  %s2341_s12 = scalar_lea.hbm %s3024_s5, 8192 }
 0x27a   : > { %p2338_p7 = scmp.ne.s32.totalorder %s2965_s25, %s2337_s7  ;;  %p2342_p0 = scmp.lt.u32.totalorder %s2965_s25, %s3024_s5 }
 0x27b   : > { %p2343_p2 = scmp.lt.u32.totalorder %s2341_s12, %s2337_s7  ;;  %p2345_p8 = scmp.lt.u32.totalorder %s2337_s7, %s2965_s25 }
 0x27c   : > { %p2339_p9 = pnand %p2338_p7, %p3036_p10 }
 0x27d   : > { %p2344_p4 = por %p2343_p2, %p2342_p0 }
 0x27e   : > { %p2340_p12 = pneg %p2339_p9 }
 0x27f   : > { %p2346_p11 = por %p2345_p8, %p2344_p4 }
 0x281   : > { %p2347_p13 = pnand %p2346_p11, %p2340_p12 }
 0x283   : > { %2350 = shalt.err (!%p2347_p13)
}
 0x284   : > { %s2410_s14 = smov 128   ;;  %s2411_s16 = smov 8  }
 0x285   : > { %2166 = dma.vmem_to_hbm [thread:$0]  (%p3036_p10), %s2967_s15, 4096, %s2965_s25, %s2973_s27, %s2410_s14, %s2410_s14, %s2411_s16  }
 0x286 PF: > { %p2178_p1 = scmp.ge.s32.totalorder %s2405_s23, 2  ;;  %s1750_s24 = sand.u32 1, %s2385_s18  }
 0x287   : > { %p3037_p3 = scmp.ne.s32.totalorder %s3030_s30, 0  ;;  %s1751_s21 = scalar_lea.sflag [#allocation4], %s1750_s24 }
 0x289   : > { %p2173_p5 = pnand %p2178_p1, %p3037_p3 }
 0x28b   : > { %2380 = dma.done.wait (!%p2173_p5), %s1751_s21, 4096  }
 0x28c   : > { %2382 = vsyncadd (!%p2173_p5), %s1751_s21, 4294963200  ;;  %s19_s23 = sadd.s32 1, %s2405_s23   ;;  %s3038_s18 = smov %s2389_s19 }
 0x28d   : > { %p16_p6 = scmp.ge.s32.totalorder %s19_s23, 4   ;;  %s3039_s19 = smov %s2393_s20 }
 0x28e   : > { %s3040_s20 = smov %s2495_s6  ;;  %s3041_s21 = smov %s2401_s22 }
 0x28f   : > { %s3042_s22 = smov %s3044_s26  ;;  %18 = sbr.rel (!%p16_p6) target bundleno = 5 (0x5), region = 80 }
 0x296   :  { %1756 = vsyncpa [#allocation3], 1 }
 0x297   :  { %1758 = vsyncpa [#allocation3 + $0x1], 1 }
 0x298   :  { %1759 = vsyncpa [#allocation4], 1 }
 0x299   :  { %1761 = vsyncpa [#allocation4 + $0x1], 1 }

</bundles_post_ra>
